<compile_context>
chip_gen: v7x
topology: tpu7x:2x2x1
jax: 0.10.0
libtpu: 0.0.40
codegen_flags: <defaults>
</compile_context>

<pallas_src>
import jax
import jax.numpy as jnp
from jax.experimental import pallas as pl
from jax.experimental.pallas import tpu as pltpu


def _sslstm_kernel(vec_ref, cc_ref, ch_ref, befcc_ref, aftcc_ref,
                   befch_ref, aftch_ref, dc_ref, dh_ref,
                   Wch_ref, Wbef_ref, Waft_ref, Wvec_ref,
                   Wsmdh_ref, Wsmcc_ref, bsm_ref,
                   ccout_ref, chout_ref, ndc_ref, ndh_ref):
    f32 = jnp.float32
    Bt, S, H = cc_ref.shape
    mm = Wch_ref.dtype            # matmul operand dtype (f32, or bf16 if requested)

    vec = vec_ref[...]            # (Bt, S, H)
    cc = cc_ref[...]
    ch = ch_ref[...]
    bef_cc = befcc_ref[...]
    aft_cc = aftcc_ref[...]
    bef_ch = befch_ref[...]
    aft_ch = aftch_ref[...]
    dc = dc_ref[...]              # (Bt, 1, H)
    dh = dh_ref[...]              # (Bt, 1, H)

    # ---------------- per-sentence ("dummy"-node) projections ----------------
    # One wide matmul for every dh-row term (gdtx/gotx/gftx + the 6 word-gate
    # dh projections) and one for the mean(ch) terms: removes all M=1 matmuls
    # from the gate math.
    dh2 = dh[:, 0, :]                                        # (Bt, H)
    c_ch = jnp.mean(ch, axis=1)                              # (Bt, H)
    small = jnp.dot(dh2.astype(mm), Wsmdh_ref[...],
                    preferred_element_type=f32) + bsm_ref[...]          # (Bt, 9H)
    small_c = jnp.dot(c_ch.astype(mm), Wsmcc_ref[...],
                      preferred_element_type=f32)                       # (Bt, 2H)

    # Reference quirk: gdtx is applied to BOTH dh and mean(ch), so its bias is
    # counted twice (already folded into b_sm).  gdth is never used.
    gdt = jax.nn.sigmoid(small[:, 0:H] + small_c[:, 0:H])               # (Bt, H)
    got = jax.nn.sigmoid(small[:, H:2 * H] + small_c[:, H:2 * H])       # (Bt, H)
    gft_dh = small[:, 2 * H:3 * H]        # dh@gftx + bg_gftx + bg_gfth  (Bt, H)
    word_dh = small[:, 3 * H:]            # dh@Wd_cat + word biases      (Bt, 6H)

    # ---------------- fused word-node matmuls (flattened to Bt*S rows) -------
    def flat(x):
        return x.reshape(Bt * S, H).astype(mm)

    y = jnp.dot(flat(ch), Wch_ref[...], preferred_element_type=f32)     # (Bt*S, 7H)
    w = (jnp.dot(flat(bef_ch), Wbef_ref[...], preferred_element_type=f32)
         + jnp.dot(flat(aft_ch), Waft_ref[...], preferred_element_type=f32)
         + jnp.dot(flat(vec), Wvec_ref[...], preferred_element_type=f32))  # (Bt*S, 6H)

    gft = jax.nn.sigmoid(y[:, :H].reshape(Bt, S, H) + gft_dh[:, None, :])
    gates = jax.nn.sigmoid((y[:, H:] + w).reshape(Bt, S, 6 * H)
                           + word_dh[:, None, :])                       # (Bt, S, 6H)

    # ---------------- sentence node: softmax over the (S + 1) rows -----------
    gdt_e = gdt[:, None, :]                                             # (Bt, 1, H)
    m = jnp.maximum(jnp.max(gft, axis=1, keepdims=True), gdt_e)
    e_gft = jnp.exp(gft - m)
    e_gdt = jnp.exp(gdt_e - m)
    inv = pl.reciprocal(jnp.sum(e_gft, axis=1, keepdims=True) + e_gdt,
                        approx=True)
    n_dc = (jnp.mean(e_gft * inv * cc, axis=1, keepdims=True)
            + e_gdt * inv * dc)                                         # (Bt, 1, H)
    # Reference quirk: n_dh uses the OLD dc, not n_dc.
    n_dh = got[:, None, :] * jnp.tanh(dc)
    ndc_ref[...] = n_dc
    ndh_ref[...] = n_dh

    # ---------------- word nodes: 5-way gate softmax + cell/hidden update ----
    f1 = gates[:, :, 0 * H:1 * H]
    f2 = gates[:, :, 1 * H:2 * H]
    f3 = gates[:, :, 2 * H:3 * H]
    f4 = gates[:, :, 3 * H:4 * H]
    it = gates[:, :, 4 * H:5 * H]
    ot = gates[:, :, 5 * H:6 * H]
    mx = jnp.maximum(jnp.maximum(jnp.maximum(f1, f2), jnp.maximum(f3, f4)), it)
    e1 = jnp.exp(f1 - mx)
    e2 = jnp.exp(f2 - mx)
    e3 = jnp.exp(f3 - mx)
    e4 = jnp.exp(f4 - mx)
    e5 = jnp.exp(it - mx)
    inv_s = pl.reciprocal(e1 + e2 + e3 + e4 + e5, approx=True)
    cc_new = (e1 * bef_cc + e2 * aft_cc + e3 * vec + e4 * dc + e5 * cc) * inv_s
    ch_new = ot * jnp.tanh(cc_new)
    ccout_ref[...] = cc_new
    chout_ref[...] = ch_new


def init_params(key, H):
    """Deterministic parameter init (PyTorch-Linear-style uniform)."""
    ks = jax.random.split(key, 7)

    def u(k, shape, fan_in):
        bound = 1.0 / (fan_in ** 0.5)
        return jax.random.uniform(k, shape, jnp.float32, -bound, bound)

    Wg = u(ks[0], (5, H, H), H)          # gdtx, gotx, goth, gftx, gfth
    bg = u(ks[1], (5, H), H)
    Wx = u(ks[2], (6, H, H), H)          # f1tx..fotx
    Wh = u(ks[3], (6, 2 * H, H), 2 * H)  # f1th..foth  (ctx is [bef_ch | aft_ch])
    Wi = u(ks[4], (6, H, H), H)          # f1ti..foti
    Wd = u(ks[5], (6, H, H), H)          # f1td..fotd
    bgate = u(ks[6], (6, H), H)          # bx + bh + bi + bd folded per gate
    return Wg, bg, Wx, Wh, Wi, Wd, bgate


def _get_before(x, step):
    B, S, H = x.shape
    return jnp.concatenate([jnp.zeros((B, step, H), x.dtype), x[:, :-step, :]], axis=1)


def _get_after(x, step):
    B, S, H = x.shape
    return jnp.concatenate([x[:, step:, :], jnp.zeros((B, step, H), x.dtype)], axis=1)


def _pick_block_b(B, S, target_rows=256):
    """Sentences per grid step so the flattened matmul M = block_b*S is large,
    while keeping the batch evenly divisible and >= 2 grid steps (v7x megacore)."""
    bb = max(1, min(B, max(1, target_rows // max(S, 1))))
    while bb > 1 and (B % bb != 0 or B // bb < 2):
        bb -= 1
    return bb


def sslstm_layer(vec, cc, ch, dc, dh, template, params, ctx_win=2,
                 block_b=None, matmul_dtype=jnp.float32):
    """Pallas forward of the SS-LSTM `layer`.  Returns (cc, ch, dc, dh)."""
    del template  # TODO(synk): SLinear template modulation not implemented.
    B, S, H = cc.shape
    Wg, bg, Wx, Wh, Wi, Wd, bgate = params

    # Context shifts (cheap XLA slicing glue).  bef/aft are passed separately,
    # so the 2H-wide ctx concat is never materialized in HBM.
    bef_ch = sum(_get_before(ch, s + 1) for s in range(ctx_win))
    aft_ch = sum(_get_after(ch, s + 1) for s in range(ctx_win))
    bef_cc = sum(_get_before(cc, s + 1) for s in range(ctx_win))
    aft_cc = sum(_get_after(cc, s + 1) for s in range(ctx_win))

    # --- fuse per-gate weights along the output dimension --------------------
    def cat6(W):  # (6, K, H) -> (K, 6H); gate g occupies columns [g*H:(g+1)*H]
        return jnp.transpose(W, (1, 0, 2)).reshape(W.shape[1], 6 * H)

    Wx_c = cat6(Wx)
    Wi_c = cat6(Wi)
    Wd_c = cat6(Wd)
    Whb_c = cat6(Wh[:, :H, :])            # ctx = [bef_ch | aft_ch]
    Wha_c = cat6(Wh[:, H:, :])
    W_ch = jnp.concatenate([Wg[4], Wx_c], axis=1)                     # (H, 7H)
    W_sm_dh = jnp.concatenate([Wg[0], Wg[1], Wg[3], Wd_c], axis=1)    # (H, 9H)
    W_sm_cc = jnp.concatenate([Wg[0], Wg[2]], axis=1)                 # (H, 2H)
    # Bias layout matches W_sm_dh columns: [gdt | got | gft | 6 word gates].
    # bg[0] counted twice on purpose (reference applies gdtx to dh AND mean(ch)).
    b_sm = jnp.concatenate([2.0 * bg[0], bg[1] + bg[2], bg[3] + bg[4],
                            bgate.reshape(-1)])[None, :]              # (1, 9H)

    # Optional bf16 matmul operands (recommended on v6e/v7x); default keeps the
    # PyTorch module's f32 numerics.
    W_ch, Whb_c, Wha_c, Wi_c, W_sm_dh, W_sm_cc = (
        w.astype(matmul_dtype) for w in (W_ch, Whb_c, Wha_c, Wi_c, W_sm_dh, W_sm_cc))

    dc3 = dc[:, None, :]                                              # (B, 1, H)
    dh3 = dh[:, None, :]

    if block_b is None:
        block_b = _pick_block_b(B, S)
    grid = (B // block_b,)

    def blk3(shape):
        return pl.BlockSpec((block_b,) + tuple(shape[1:]), lambda b: (b, 0, 0))

    def full2(arr):
        return pl.BlockSpec(arr.shape, lambda b: (0, 0))

    in_specs = [
        blk3(vec.shape), blk3(cc.shape), blk3(ch.shape),
        blk3(bef_cc.shape), blk3(aft_cc.shape),
        blk3(bef_ch.shape), blk3(aft_ch.shape),
        blk3(dc3.shape), blk3(dh3.shape),
        full2(W_ch), full2(Whb_c), full2(Wha_c), full2(Wi_c),
        full2(W_sm_dh), full2(W_sm_cc), full2(b_sm),
    ]
    out_specs = (
        blk3((B, S, H)), blk3((B, S, H)), blk3((B, 1, H)), blk3((B, 1, H)),
    )
    out_shape = (
        jax.ShapeDtypeStruct((B, S, H), jnp.float32),
        jax.ShapeDtypeStruct((B, S, H), jnp.float32),
        jax.ShapeDtypeStruct((B, 1, H), jnp.float32),
        jax.ShapeDtypeStruct((B, 1, H), jnp.float32),
    )

    cc_new, ch_new, n_dc, n_dh = pl.pallas_call(
        _sslstm_kernel,
        out_shape=out_shape,
        grid=grid,
        in_specs=in_specs,
        out_specs=out_specs,
        compiler_params=pltpu.CompilerParams(
            dimension_semantics=("parallel",),
            vmem_limit_bytes=64 * 1024 * 1024),
    )(vec, cc, ch, bef_cc, aft_cc, bef_ch, aft_ch, dc3, dh3,
      W_ch, Whb_c, Wha_c, Wi_c, W_sm_dh, W_sm_cc, b_sm)

    return cc_new, ch_new, n_dc[:, 0, :], n_dh[:, 0, :]


def reference(vec, cc, ch, dc, dh, params, ctx_win=2):
    """Pure-JAX mirror of the PyTorch forward (for verification)."""
    Wg, bg, Wx, Wh, Wi, Wd, bgate = params
    B, S, H = cc.shape
    lin = lambda x, W, b: x @ W + b

    c_ch = jnp.mean(ch, axis=1)
    e_dh = jnp.broadcast_to(dh[:, None, :], (B, S, H))
    gdt = jax.nn.sigmoid(lin(dh, Wg[0], bg[0]) + lin(c_ch, Wg[0], bg[0]))
    got = jax.nn.sigmoid(lin(dh, Wg[1], bg[1]) + lin(c_ch, Wg[2], bg[2]))
    gft = jax.nn.sigmoid(lin(e_dh, Wg[3], bg[3]) + lin(ch, Wg[4], bg[4]))
    cat_sf = jax.nn.softmax(jnp.concatenate([gft, gdt[:, None, :]], axis=1), axis=1)
    gft = cat_sf[:, :S, :]
    gdt = cat_sf[:, S, :]
    n_dc = jnp.mean(gft * cc, axis=1) + gdt * dc
    n_dh = got * jnp.tanh(dc)

    bef_ch = sum(_get_before(ch, s + 1) for s in range(ctx_win))
    aft_ch = sum(_get_after(ch, s + 1) for s in range(ctx_win))
    bef_cc = sum(_get_before(cc, s + 1) for s in range(ctx_win))
    aft_cc = sum(_get_after(cc, s + 1) for s in range(ctx_win))
    ctx_ch = jnp.concatenate([bef_ch, aft_ch], axis=-1)
    e_dc = jnp.broadcast_to(dc[:, None, :], (B, S, H))

    gates = []
    for g in range(6):
        z = ch @ Wx[g] + ctx_ch @ Wh[g] + vec @ Wi[g] + e_dh @ Wd[g] + bgate[g]
        gates.append(jax.nn.sigmoid(z))
    f1, f2, f3, f4, it, ot = gates
    c15 = jax.nn.softmax(jnp.stack([f1, f2, f3, f4, it], axis=1), axis=1)
    f1, f2, f3, f4, it = (c15[:, k] for k in range(5))
    cc_new = f1 * bef_cc + f2 * aft_cc + f3 * vec + f4 * e_dc + it * cc
    ch_new = ot * jnp.tanh(cc_new)
    return cc_new, ch_new, n_dc, n_dh


if __name__ == "__main__":
    B, S, H = 2, 8, 32
    key = jax.random.PRNGKey(0)
    k_in, k_p = jax.random.split(key)
    ks = jax.random.split(k_in, 6)
    vec = jax.random.normal(ks[0], (B, S, H), jnp.float32)
    cc = jax.random.normal(ks[1], (B, S, H), jnp.float32)
    ch = jax.random.normal(ks[2], (B, S, H), jnp.float32)
    dc = jax.random.normal(ks[3], (B, H), jnp.float32)
    dh = jax.random.normal(ks[4], (B, H), jnp.float32)
    template = jax.random.normal(ks[5], (S, H), jnp.float32)  # placeholder (unused)

    params = init_params(k_p, H)

    out = sslstm_layer(vec, cc, ch, dc, dh, template, params, ctx_win=2)
    out = jax.block_until_ready(out)

    ref = reference(vec, cc, ch, dc, dh, params, ctx_win=2)
    names = ("cc", "ch", "dc", "dh")
    # Tolerance loosened slightly versus exact division: the softmax
    # denominators now use the approximate EUP reciprocal.
    for name, o, r in zip(names, out, ref):
        assert o.shape == r.shape, (name, o.shape, r.shape)
        assert jnp.allclose(o, r, atol=1e-2, rtol=1e-2), (
            name, float(jnp.max(jnp.abs(o - r))))

    print("KERNEL_OK")
</pallas_src>

<mosaic_0001>
module attributes {stable_mosaic.version = 11 : i64} {
  func.func @_sslstm_kernel(%arg0: i32, %arg1: memref<1x8x32xf32, #tpu.memory_space<vmem>>, %arg2: memref<1x8x32xf32, #tpu.memory_space<vmem>>, %arg3: memref<1x8x32xf32, #tpu.memory_space<vmem>>, %arg4: memref<1x8x32xf32, #tpu.memory_space<vmem>>, %arg5: memref<1x8x32xf32, #tpu.memory_space<vmem>>, %arg6: memref<1x8x32xf32, #tpu.memory_space<vmem>>, %arg7: memref<1x8x32xf32, #tpu.memory_space<vmem>>, %arg8: memref<1x1x32xf32, #tpu.memory_space<vmem>>, %arg9: memref<1x1x32xf32, #tpu.memory_space<vmem>>, %arg10: memref<32x224xf32, #tpu.memory_space<vmem>>, %arg11: memref<32x192xf32, #tpu.memory_space<vmem>>, %arg12: memref<32x192xf32, #tpu.memory_space<vmem>>, %arg13: memref<32x192xf32, #tpu.memory_space<vmem>>, %arg14: memref<32x288xf32, #tpu.memory_space<vmem>>, %arg15: memref<32x64xf32, #tpu.memory_space<vmem>>, %arg16: memref<1x288xf32, #tpu.memory_space<vmem>>, %arg17: memref<1x8x32xf32, #tpu.memory_space<vmem>>, %arg18: memref<1x8x32xf32, #tpu.memory_space<vmem>>, %arg19: memref<1x1x32xf32, #tpu.memory_space<vmem>>, %arg20: memref<1x1x32xf32, #tpu.memory_space<vmem>>) attributes {dimension_semantics = [#tpu.dimension_semantics<parallel>], iteration_bounds = array<i64: 2>, scalar_prefetch = 0 : i64, scratch_operands = 0 : i64, tpu.core_type = #tpu.core_type<tc>, window_params = [{transform_indices = @transform_0, window_bounds = array<i64: 1, 8, 32>}, {transform_indices = @transform_1, window_bounds = array<i64: 1, 8, 32>}, {transform_indices = @transform_2, window_bounds = array<i64: 1, 8, 32>}, {transform_indices = @transform_3, window_bounds = array<i64: 1, 8, 32>}, {transform_indices = @transform_4, window_bounds = array<i64: 1, 8, 32>}, {transform_indices = @transform_5, window_bounds = array<i64: 1, 8, 32>}, {transform_indices = @transform_6, window_bounds = array<i64: 1, 8, 32>}, {transform_indices = @transform_7, window_bounds = array<i64: 1, 1, 32>}, {transform_indices = @transform_8, window_bounds = array<i64: 1, 1, 32>}, {pipeline_mode = #tpu.pipeline_mode<synchronous>, transform_indices = @transform_9, window_bounds = array<i64: 32, 224>}, {pipeline_mode = #tpu.pipeline_mode<synchronous>, transform_indices = @transform_10, window_bounds = array<i64: 32, 192>}, {pipeline_mode = #tpu.pipeline_mode<synchronous>, transform_indices = @transform_11, window_bounds = array<i64: 32, 192>}, {pipeline_mode = #tpu.pipeline_mode<synchronous>, transform_indices = @transform_12, window_bounds = array<i64: 32, 192>}, {pipeline_mode = #tpu.pipeline_mode<synchronous>, transform_indices = @transform_13, window_bounds = array<i64: 32, 288>}, {pipeline_mode = #tpu.pipeline_mode<synchronous>, transform_indices = @transform_14, window_bounds = array<i64: 32, 64>}, {pipeline_mode = #tpu.pipeline_mode<synchronous>, transform_indices = @transform_15, window_bounds = array<i64: 1, 288>}, {transform_indices = @transform_16, window_bounds = array<i64: 1, 8, 32>}, {transform_indices = @transform_17, window_bounds = array<i64: 1, 8, 32>}, {transform_indices = @transform_18, window_bounds = array<i64: 1, 1, 32>}, {transform_indices = @transform_19, window_bounds = array<i64: 1, 1, 32>}]} {
    %c0 = arith.constant 0 : index
    %c0_0 = arith.constant 0 : index
    %c0_1 = arith.constant 0 : index
    %0 = vector.load %arg1[%c0, %c0_0, %c0_1] : memref<1x8x32xf32, #tpu.memory_space<vmem>>, vector<1x8x32xf32>
    %c0_2 = arith.constant 0 : index
    %c0_3 = arith.constant 0 : index
    %c0_4 = arith.constant 0 : index
    %1 = vector.load %arg2[%c0_2, %c0_3, %c0_4] : memref<1x8x32xf32, #tpu.memory_space<vmem>>, vector<1x8x32xf32>
    %c0_5 = arith.constant 0 : index
    %c0_6 = arith.constant 0 : index
    %c0_7 = arith.constant 0 : index
    %2 = vector.load %arg3[%c0_5, %c0_6, %c0_7] : memref<1x8x32xf32, #tpu.memory_space<vmem>>, vector<1x8x32xf32>
    %c0_8 = arith.constant 0 : index
    %c0_9 = arith.constant 0 : index
    %c0_10 = arith.constant 0 : index
    %3 = vector.load %arg4[%c0_8, %c0_9, %c0_10] : memref<1x8x32xf32, #tpu.memory_space<vmem>>, vector<1x8x32xf32>
    %c0_11 = arith.constant 0 : index
    %c0_12 = arith.constant 0 : index
    %c0_13 = arith.constant 0 : index
    %4 = vector.load %arg5[%c0_11, %c0_12, %c0_13] : memref<1x8x32xf32, #tpu.memory_space<vmem>>, vector<1x8x32xf32>
    %c0_14 = arith.constant 0 : index
    %c0_15 = arith.constant 0 : index
    %c0_16 = arith.constant 0 : index
    %5 = vector.load %arg6[%c0_14, %c0_15, %c0_16] : memref<1x8x32xf32, #tpu.memory_space<vmem>>, vector<1x8x32xf32>
    %c0_17 = arith.constant 0 : index
    %c0_18 = arith.constant 0 : index
    %c0_19 = arith.constant 0 : index
    %6 = vector.load %arg7[%c0_17, %c0_18, %c0_19] : memref<1x8x32xf32, #tpu.memory_space<vmem>>, vector<1x8x32xf32>
    %c0_20 = arith.constant 0 : index
    %c0_21 = arith.constant 0 : index
    %c0_22 = arith.constant 0 : index
    %7 = vector.load %arg8[%c0_20, %c0_21, %c0_22] : memref<1x1x32xf32, #tpu.memory_space<vmem>>, vector<1x1x32xf32>
    %c0_23 = arith.constant 0 : index
    %c0_24 = arith.constant 0 : index
    %c0_25 = arith.constant 0 : index
    %8 = vector.load %arg9[%c0_23, %c0_24, %c0_25] : memref<1x1x32xf32, #tpu.memory_space<vmem>>, vector<1x1x32xf32>
    %9 = vector.shape_cast %8 : vector<1x1x32xf32> to vector<1x32xf32>
    %cst = arith.constant dense<0.000000e+00> : vector<1x32xf32>
    %10 = vector.multi_reduction <add>, %2, %cst [1] : vector<1x8x32xf32> to vector<1x32xf32>
    %cst_26 = arith.constant 8.000000e+00 : f32
    %11 = vector.broadcast %cst_26 : f32 to vector<1x32xf32>
    %12 = arith.divf %10, %11 : vector<1x32xf32>
    %c0_27 = arith.constant 0 : index
    %c0_28 = arith.constant 0 : index
    %13 = vector.load %arg14[%c0_27, %c0_28] : memref<32x288xf32, #tpu.memory_space<vmem>>, vector<32x288xf32>
    %cst_29 = arith.constant dense<0.000000e+00> : vector<1x288xf32>
    %14 = tpu.matmul %9, %13, %cst_29 {dimension_numbers = #tpu.dot_dimension_numbers<[1], [0], [0], [1], [0, 0, 1, 1], [], []>} : vector<1x32xf32>, vector<32x288xf32>, vector<1x288xf32> -> vector<1x288xf32>
    %c0_30 = arith.constant 0 : index
    %c0_31 = arith.constant 0 : index
    %15 = vector.load %arg16[%c0_30, %c0_31] : memref<1x288xf32, #tpu.memory_space<vmem>>, vector<1x288xf32>
    %16 = arith.addf %14, %15 : vector<1x288xf32>
    %c0_32 = arith.constant 0 : index
    %c0_33 = arith.constant 0 : index
    %17 = vector.load %arg15[%c0_32, %c0_33] : memref<32x64xf32, #tpu.memory_space<vmem>>, vector<32x64xf32>
    %cst_34 = arith.constant dense<0.000000e+00> : vector<1x64xf32>
    %18 = tpu.matmul %12, %17, %cst_34 {dimension_numbers = #tpu.dot_dimension_numbers<[1], [0], [0], [1], [0, 0, 1, 1], [], []>} : vector<1x32xf32>, vector<32x64xf32>, vector<1x64xf32> -> vector<1x64xf32>
    %19 = vector.extract_strided_slice %16 {offsets = [0, 0], sizes = [1, 32], strides = [1, 1]} : vector<1x288xf32> to vector<1x32xf32>
    %20 = vector.extract_strided_slice %18 {offsets = [0, 0], sizes = [1, 32], strides = [1, 1]} : vector<1x64xf32> to vector<1x32xf32>
    %21 = arith.addf %19, %20 : vector<1x32xf32>
    %22 = arith.negf %21 : vector<1x32xf32>
    %23 = math.exp %22 : vector<1x32xf32>
    %cst_35 = arith.constant 1.000000e+00 : f32
    %24 = vector.broadcast %cst_35 : f32 to vector<1x32xf32>
    %25 = arith.addf %24, %23 : vector<1x32xf32>
    %26 = arith.divf %24, %25 : vector<1x32xf32>
    %27 = vector.extract_strided_slice %16 {offsets = [0, 32], sizes = [1, 32], strides = [1, 1]} : vector<1x288xf32> to vector<1x32xf32>
    %28 = vector.extract_strided_slice %18 {offsets = [0, 32], sizes = [1, 32], strides = [1, 1]} : vector<1x64xf32> to vector<1x32xf32>
    %29 = arith.addf %27, %28 : vector<1x32xf32>
    %30 = arith.negf %29 : vector<1x32xf32>
    %31 = math.exp %30 : vector<1x32xf32>
    %cst_36 = arith.constant 1.000000e+00 : f32
    %32 = vector.broadcast %cst_36 : f32 to vector<1x32xf32>
    %33 = arith.addf %32, %31 : vector<1x32xf32>
    %34 = arith.divf %32, %33 : vector<1x32xf32>
    %35 = vector.extract_strided_slice %16 {offsets = [0, 64], sizes = [1, 32], strides = [1, 1]} : vector<1x288xf32> to vector<1x32xf32>
    %36 = vector.extract_strided_slice %16 {offsets = [0, 96], sizes = [1, 192], strides = [1, 1]} : vector<1x288xf32> to vector<1x192xf32>
    %37 = vector.shape_cast %2 : vector<1x8x32xf32> to vector<8x32xf32>
    %c0_37 = arith.constant 0 : index
    %c0_38 = arith.constant 0 : index
    %38 = vector.load %arg10[%c0_37, %c0_38] : memref<32x224xf32, #tpu.memory_space<vmem>>, vector<32x224xf32>
    %cst_39 = arith.constant dense<0.000000e+00> : vector<8x224xf32>
    %39 = tpu.matmul %37, %38, %cst_39 {dimension_numbers = #tpu.dot_dimension_numbers<[1], [0], [0], [1], [0, 0, 1, 1], [], []>} : vector<8x32xf32>, vector<32x224xf32>, vector<8x224xf32> -> vector<8x224xf32>
    %40 = vector.shape_cast %5 : vector<1x8x32xf32> to vector<8x32xf32>
    %c0_40 = arith.constant 0 : index
    %c0_41 = arith.constant 0 : index
    %41 = vector.load %arg11[%c0_40, %c0_41] : memref<32x192xf32, #tpu.memory_space<vmem>>, vector<32x192xf32>
    %cst_42 = arith.constant dense<0.000000e+00> : vector<8x192xf32>
    %42 = tpu.matmul %40, %41, %cst_42 {dimension_numbers = #tpu.dot_dimension_numbers<[1], [0], [0], [1], [0, 0, 1, 1], [], []>} : vector<8x32xf32>, vector<32x192xf32>, vector<8x192xf32> -> vector<8x192xf32>
    %43 = vector.shape_cast %6 : vector<1x8x32xf32> to vector<8x32xf32>
    %c0_43 = arith.constant 0 : index
    %c0_44 = arith.constant 0 : index
    %44 = vector.load %arg12[%c0_43, %c0_44] : memref<32x192xf32, #tpu.memory_space<vmem>>, vector<32x192xf32>
    %cst_45 = arith.constant dense<0.000000e+00> : vector<8x192xf32>
    %45 = tpu.matmul %43, %44, %cst_45 {dimension_numbers = #tpu.dot_dimension_numbers<[1], [0], [0], [1], [0, 0, 1, 1], [], []>} : vector<8x32xf32>, vector<32x192xf32>, vector<8x192xf32> -> vector<8x192xf32>
    %46 = arith.addf %42, %45 : vector<8x192xf32>
    %47 = vector.shape_cast %0 : vector<1x8x32xf32> to vector<8x32xf32>
    %c0_46 = arith.constant 0 : index
    %c0_47 = arith.constant 0 : index
    %48 = vector.load %arg13[%c0_46, %c0_47] : memref<32x192xf32, #tpu.memory_space<vmem>>, vector<32x192xf32>
    %cst_48 = arith.constant dense<0.000000e+00> : vector<8x192xf32>
    %49 = tpu.matmul %47, %48, %cst_48 {dimension_numbers = #tpu.dot_dimension_numbers<[1], [0], [0], [1], [0, 0, 1, 1], [], []>} : vector<8x32xf32>, vector<32x192xf32>, vector<8x192xf32> -> vector<8x192xf32>
    %50 = arith.addf %46, %49 : vector<8x192xf32>
    %51 = vector.extract_strided_slice %39 {offsets = [0, 0], sizes = [8, 32], strides = [1, 1]} : vector<8x224xf32> to vector<8x32xf32>
    %52 = vector.shape_cast %51 : vector<8x32xf32> to vector<1x8x32xf32>
    %53 = vector.shape_cast %35 : vector<1x32xf32> to vector<1x1x32xf32>
    %54 = vector.broadcast %53 : vector<1x1x32xf32> to vector<1x8x32xf32>
    %55 = arith.addf %52, %54 : vector<1x8x32xf32>
    %56 = arith.negf %55 : vector<1x8x32xf32>
    %57 = math.exp %56 : vector<1x8x32xf32>
    %cst_49 = arith.constant 1.000000e+00 : f32
    %58 = vector.broadcast %cst_49 : f32 to vector<1x8x32xf32>
    %59 = arith.addf %58, %57 : vector<1x8x32xf32>
    %60 = arith.divf %58, %59 : vector<1x8x32xf32>
    %61 = vector.extract_strided_slice %39 {offsets = [0, 32], sizes = [8, 192], strides = [1, 1]} : vector<8x224xf32> to vector<8x192xf32>
    %62 = arith.addf %61, %50 : vector<8x192xf32>
    %63 = vector.shape_cast %62 : vector<8x192xf32> to vector<1x8x192xf32>
    %64 = vector.shape_cast %36 : vector<1x192xf32> to vector<1x1x192xf32>
    %65 = vector.broadcast %64 : vector<1x1x192xf32> to vector<1x8x192xf32>
    %66 = arith.addf %63, %65 : vector<1x8x192xf32>
    %67 = arith.negf %66 : vector<1x8x192xf32>
    %68 = math.exp %67 : vector<1x8x192xf32>
    %cst_50 = arith.constant 1.000000e+00 : f32
    %69 = vector.broadcast %cst_50 : f32 to vector<1x8x192xf32>
    %70 = arith.addf %69, %68 : vector<1x8x192xf32>
    %71 = arith.divf %69, %70 : vector<1x8x192xf32>
    %72 = vector.shape_cast %26 : vector<1x32xf32> to vector<1x1x32xf32>
    %cst_51 = arith.constant dense<0xFF800000> : vector<1x32xf32>
    %73 = vector.multi_reduction <maximumf>, %60, %cst_51 [1] : vector<1x8x32xf32> to vector<1x32xf32>
    %74 = vector.shape_cast %73 : vector<1x32xf32> to vector<1x1x32xf32>
    %75 = arith.maximumf %74, %72 : vector<1x1x32xf32>
    %76 = vector.broadcast %75 : vector<1x1x32xf32> to vector<1x8x32xf32>
    %77 = arith.subf %60, %76 : vector<1x8x32xf32>
    %78 = math.exp %77 : vector<1x8x32xf32>
    %79 = arith.subf %72, %75 : vector<1x1x32xf32>
    %80 = math.exp %79 : vector<1x1x32xf32>
    %cst_52 = arith.constant dense<0.000000e+00> : vector<1x32xf32>
    %81 = vector.multi_reduction <add>, %78, %cst_52 [1] : vector<1x8x32xf32> to vector<1x32xf32>
    %82 = vector.shape_cast %81 : vector<1x32xf32> to vector<1x1x32xf32>
    %83 = arith.addf %82, %80 : vector<1x1x32xf32>
    %84 = tpu.reciprocal %83 {approx = true} : vector<1x1x32xf32> -> vector<1x1x32xf32>
    %85 = vector.broadcast %84 : vector<1x1x32xf32> to vector<1x8x32xf32>
    %86 = arith.mulf %78, %85 : vector<1x8x32xf32>
    %87 = arith.mulf %86, %1 : vector<1x8x32xf32>
    %cst_53 = arith.constant dense<0.000000e+00> : vector<1x32xf32>
    %88 = vector.multi_reduction <add>, %87, %cst_53 [1] : vector<1x8x32xf32> to vector<1x32xf32>
    %89 = vector.shape_cast %88 : vector<1x32xf32> to vector<1x1x32xf32>
    %cst_54 = arith.constant 8.000000e+00 : f32
    %90 = vector.broadcast %cst_54 : f32 to vector<1x1x32xf32>
    %91 = arith.divf %89, %90 : vector<1x1x32xf32>
    %92 = arith.mulf %80, %84 : vector<1x1x32xf32>
    %93 = arith.mulf %92, %7 : vector<1x1x32xf32>
    %94 = arith.addf %91, %93 : vector<1x1x32xf32>
    %95 = vector.shape_cast %34 : vector<1x32xf32> to vector<1x1x32xf32>
    %96 = math.tanh %7 : vector<1x1x32xf32>
    %97 = arith.mulf %95, %96 : vector<1x1x32xf32>
    %c0_55 = arith.constant 0 : index
    %c0_56 = arith.constant 0 : index
    %c0_57 = arith.constant 0 : index
    %98 = vector.load %arg19[%c0_55, %c0_56, %c0_57] : memref<1x1x32xf32, #tpu.memory_space<vmem>>, vector<1x1x32xf32>
    tpu.vector_store %arg19[%c0_55, %c0_56, %c0_57], %94 {strides = array<i32>} : memref<1x1x32xf32, #tpu.memory_space<vmem>>, vector<1x1x32xf32>,
    %c0_58 = arith.constant 0 : index
    %c0_59 = arith.constant 0 : index
    %c0_60 = arith.constant 0 : index
    %99 = vector.load %arg20[%c0_58, %c0_59, %c0_60] : memref<1x1x32xf32, #tpu.memory_space<vmem>>, vector<1x1x32xf32>
    tpu.vector_store %arg20[%c0_58, %c0_59, %c0_60], %97 {strides = array<i32>} : memref<1x1x32xf32, #tpu.memory_space<vmem>>, vector<1x1x32xf32>,
    %100 = vector.extract_strided_slice %71 {offsets = [0, 0, 0], sizes = [1, 8, 32], strides = [1, 1, 1]} : vector<1x8x192xf32> to vector<1x8x32xf32>
    %101 = vector.extract_strided_slice %71 {offsets = [0, 0, 32], sizes = [1, 8, 32], strides = [1, 1, 1]} : vector<1x8x192xf32> to vector<1x8x32xf32>
    %102 = vector.extract_strided_slice %71 {offsets = [0, 0, 64], sizes = [1, 8, 32], strides = [1, 1, 1]} : vector<1x8x192xf32> to vector<1x8x32xf32>
    %103 = vector.extract_strided_slice %71 {offsets = [0, 0, 96], sizes = [1, 8, 32], strides = [1, 1, 1]} : vector<1x8x192xf32> to vector<1x8x32xf32>
    %104 = vector.extract_strided_slice %71 {offsets = [0, 0, 128], sizes = [1, 8, 32], strides = [1, 1, 1]} : vector<1x8x192xf32> to vector<1x8x32xf32>
    %105 = vector.extract_strided_slice %71 {offsets = [0, 0, 160], sizes = [1, 8, 32], strides = [1, 1, 1]} : vector<1x8x192xf32> to vector<1x8x32xf32>
    %106 = arith.maximumf %100, %101 : vector<1x8x32xf32>
    %107 = arith.maximumf %102, %103 : vector<1x8x32xf32>
    %108 = arith.maximumf %106, %107 : vector<1x8x32xf32>
    %109 = arith.maximumf %108, %104 : vector<1x8x32xf32>
    %110 = arith.subf %100, %109 : vector<1x8x32xf32>
    %111 = math.exp %110 : vector<1x8x32xf32>
    %112 = arith.subf %101, %109 : vector<1x8x32xf32>
    %113 = math.exp %112 : vector<1x8x32xf32>
    %114 = arith.subf %102, %109 : vector<1x8x32xf32>
    %115 = math.exp %114 : vector<1x8x32xf32>
    %116 = arith.subf %103, %109 : vector<1x8x32xf32>
    %117 = math.exp %116 : vector<1x8x32xf32>
    %118 = arith.subf %104, %109 : vector<1x8x32xf32>
    %119 = math.exp %118 : vector<1x8x32xf32>
    %120 = arith.addf %111, %113 : vector<1x8x32xf32>
    %121 = arith.addf %120, %115 : vector<1x8x32xf32>
    %122 = arith.addf %121, %117 : vector<1x8x32xf32>
    %123 = arith.addf %122, %119 : vector<1x8x32xf32>
    %124 = tpu.reciprocal %123 {approx = true} : vector<1x8x32xf32> -> vector<1x8x32xf32>
    %125 = arith.mulf %111, %3 : vector<1x8x32xf32>
    %126 = arith.mulf %113, %4 : vector<1x8x32xf32>
    %127 = arith.addf %125, %126 : vector<1x8x32xf32>
    %128 = arith.mulf %115, %0 : vector<1x8x32xf32>
    %129 = arith.addf %127, %128 : vector<1x8x32xf32>
    %130 = vector.broadcast %7 : vector<1x1x32xf32> to vector<1x8x32xf32>
    %131 = arith.mulf %117, %130 : vector<1x8x32xf32>
    %132 = arith.addf %129, %131 : vector<1x8x32xf32>
    %133 = arith.mulf %119, %1 : vector<1x8x32xf32>
    %134 = arith.addf %132, %133 : vector<1x8x32xf32>
    %135 = arith.mulf %134, %124 : vector<1x8x32xf32>
    %136 = math.tanh %135 : vector<1x8x32xf32>
    %137 = arith.mulf %105, %136 : vector<1x8x32xf32>
    %c0_61 = arith.constant 0 : index
    %c0_62 = arith.constant 0 : index
    %c0_63 = arith.constant 0 : index
    %138 = vector.load %arg17[%c0_61, %c0_62, %c0_63] : memref<1x8x32xf32, #tpu.memory_space<vmem>>, vector<1x8x32xf32>
    tpu.vector_store %arg17[%c0_61, %c0_62, %c0_63], %135 {strides = array<i32>} : memref<1x8x32xf32, #tpu.memory_space<vmem>>, vector<1x8x32xf32>,
    %c0_64 = arith.constant 0 : index
    %c0_65 = arith.constant 0 : index
    %c0_66 = arith.constant 0 : index
    %139 = vector.load %arg18[%c0_64, %c0_65, %c0_66] : memref<1x8x32xf32, #tpu.memory_space<vmem>>, vector<1x8x32xf32>
    tpu.vector_store %arg18[%c0_64, %c0_65, %c0_66], %137 {strides = array<i32>} : memref<1x8x32xf32, #tpu.memory_space<vmem>>, vector<1x8x32xf32>,
    return
  }
  func.func @transform_0(%arg0: i32) -> (i32, i32, i32) {
    %c0_i32 = arith.constant 0 : i32
    %c0_i32_0 = arith.constant 0 : i32
    %c0_i32_1 = arith.constant 0 : i32
    return %arg0, %c0_i32, %c0_i32_0 : i32, i32, i32
  }
  func.func @transform_1(%arg0: i32) -> (i32, i32, i32) {
    %c0_i32 = arith.constant 0 : i32
    %c0_i32_0 = arith.constant 0 : i32
    %c0_i32_1 = arith.constant 0 : i32
    return %arg0, %c0_i32, %c0_i32_0 : i32, i32, i32
  }
  func.func @transform_2(%arg0: i32) -> (i32, i32, i32) {
    %c0_i32 = arith.constant 0 : i32
    %c0_i32_0 = arith.constant 0 : i32
    %c0_i32_1 = arith.constant 0 : i32
    return %arg0, %c0_i32, %c0_i32_0 : i32, i32, i32
  }
  func.func @transform_3(%arg0: i32) -> (i32, i32, i32) {
    %c0_i32 = arith.constant 0 : i32
    %c0_i32_0 = arith.constant 0 : i32
    %c0_i32_1 = arith.constant 0 : i32
    return %arg0, %c0_i32, %c0_i32_0 : i32, i32, i32
  }
  func.func @transform_4(%arg0: i32) -> (i32, i32, i32) {
    %c0_i32 = arith.constant 0 : i32
    %c0_i32_0 = arith.constant 0 : i32
    %c0_i32_1 = arith.constant 0 : i32
    return %arg0, %c0_i32, %c0_i32_0 : i32, i32, i32
  }
  func.func @transform_5(%arg0: i32) -> (i32, i32, i32) {
    %c0_i32 = arith.constant 0 : i32
    %c0_i32_0 = arith.constant 0 : i32
    %c0_i32_1 = arith.constant 0 : i32
    return %arg0, %c0_i32, %c0_i32_0 : i32, i32, i32
  }
  func.func @transform_6(%arg0: i32) -> (i32, i32, i32) {
    %c0_i32 = arith.constant 0 : i32
    %c0_i32_0 = arith.constant 0 : i32
    %c0_i32_1 = arith.constant 0 : i32
    return %arg0, %c0_i32, %c0_i32_0 : i32, i32, i32
  }
  func.func @transform_7(%arg0: i32) -> (i32, i32, i32) {
    %c0_i32 = arith.constant 0 : i32
    %c0_i32_0 = arith.constant 0 : i32
    %c0_i32_1 = arith.constant 0 : i32
    return %arg0, %c0_i32, %c0_i32_0 : i32, i32, i32
  }
  func.func @transform_8(%arg0: i32) -> (i32, i32, i32) {
    %c0_i32 = arith.constant 0 : i32
    %c0_i32_0 = arith.constant 0 : i32
    %c0_i32_1 = arith.constant 0 : i32
    return %arg0, %c0_i32, %c0_i32_0 : i32, i32, i32
  }
  func.func @transform_9(%arg0: i32) -> (i32, i32) {
    %c0_i32 = arith.constant 0 : i32
    %c0_i32_0 = arith.constant 0 : i32
    %c0_i32_1 = arith.constant 0 : i32
    return %c0_i32, %c0_i32_0 : i32, i32
  }
  func.func @transform_10(%arg0: i32) -> (i32, i32) {
    %c0_i32 = arith.constant 0 : i32
    %c0_i32_0 = arith.constant 0 : i32
    %c0_i32_1 = arith.constant 0 : i32
    return %c0_i32, %c0_i32_0 : i32, i32
  }
  func.func @transform_11(%arg0: i32) -> (i32, i32) {
    %c0_i32 = arith.constant 0 : i32
    %c0_i32_0 = arith.constant 0 : i32
    %c0_i32_1 = arith.constant 0 : i32
    return %c0_i32, %c0_i32_0 : i32, i32
  }
  func.func @transform_12(%arg0: i32) -> (i32, i32) {
    %c0_i32 = arith.constant 0 : i32
    %c0_i32_0 = arith.constant 0 : i32
    %c0_i32_1 = arith.constant 0 : i32
    return %c0_i32, %c0_i32_0 : i32, i32
  }
  func.func @transform_13(%arg0: i32) -> (i32, i32) {
    %c0_i32 = arith.constant 0 : i32
    %c0_i32_0 = arith.constant 0 : i32
    %c0_i32_1 = arith.constant 0 : i32
    return %c0_i32, %c0_i32_0 : i32, i32
  }
  func.func @transform_14(%arg0: i32) -> (i32, i32) {
    %c0_i32 = arith.constant 0 : i32
    %c0_i32_0 = arith.constant 0 : i32
    %c0_i32_1 = arith.constant 0 : i32
    return %c0_i32, %c0_i32_0 : i32, i32
  }
  func.func @transform_15(%arg0: i32) -> (i32, i32) {
    %c0_i32 = arith.constant 0 : i32
    %c0_i32_0 = arith.constant 0 : i32
    %c0_i32_1 = arith.constant 0 : i32
    return %c0_i32, %c0_i32_0 : i32, i32
  }
  func.func @transform_16(%arg0: i32) -> (i32, i32, i32) {
    %c0_i32 = arith.constant 0 : i32
    %c0_i32_0 = arith.constant 0 : i32
    %c0_i32_1 = arith.constant 0 : i32
    return %arg0, %c0_i32, %c0_i32_0 : i32, i32, i32
  }
  func.func @transform_17(%arg0: i32) -> (i32, i32, i32) {
    %c0_i32 = arith.constant 0 : i32
    %c0_i32_0 = arith.constant 0 : i32
    %c0_i32_1 = arith.constant 0 : i32
    return %arg0, %c0_i32, %c0_i32_0 : i32, i32, i32
  }
  func.func @transform_18(%arg0: i32) -> (i32, i32, i32) {
    %c0_i32 = arith.constant 0 : i32
    %c0_i32_0 = arith.constant 0 : i32
    %c0_i32_1 = arith.constant 0 : i32
    return %arg0, %c0_i32, %c0_i32_0 : i32, i32, i32
  }
  func.func @transform_19(%arg0: i32) -> (i32, i32, i32) {
    %c0_i32 = arith.constant 0 : i32
    %c0_i32_0 = arith.constant 0 : i32
    %c0_i32_1 = arith.constant 0 : i32
    return %arg0, %c0_i32, %c0_i32_0 : i32, i32, i32
  }
}

</mosaic_0001>

<bundles_post_ra>
// kernel: tpu_custom_call.1
= control target key start
LH: loop header
LB: loop body
LE: loop exit
PB: predicated region body
PF: predicated region fallthrough
CT: control target
= control target key end

     0   :  { %s4320_s0 = inlined_call_operand.hbm [shape: f32[2,8,32], index: 0, kind: input, shape index: {}]   ;;  %s4321_s1 = inlined_call_operand.hbm [shape: f32[2,8,32], index: 1, kind: input, shape index: {}]   ;;  %s4322_s2 = inlined_call_operand.hbm [shape: f32[2,8,32], index: 2, kind: input, shape index: {}]   ;;  %s4323_s3 = inlined_call_operand.hbm [shape: f32[2,8,32], index: 3, kind: input, shape index: {}]   ;;  %s4324_s4 = inlined_call_operand.hbm [shape: f32[2,8,32], index: 4, kind: input, shape index: {}]   ;;  %s4325_s5 = inlined_call_operand.hbm [shape: f32[2,8,32], index: 5, kind: input, shape index: {}]   ;;  %s4326_s6 = inlined_call_operand.hbm [shape: f32[2,8,32], index: 6, kind: input, shape index: {}]   ;;  %s4327_s7 = inlined_call_operand.hbm [shape: f32[2,1,32], index: 7, kind: input, shape index: {}]   ;;  %s4328_s8 = inlined_call_operand.hbm [shape: f32[2,1,32], index: 8, kind: input, shape index: {}]   ;;  %s4329_s9 = inlined_call_operand.hbm [shape: f32[32,224], index: 9, kind: input, shape index: {}]   ;;  %s4330_s10 = inlined_call_operand.hbm [shape: f32[32,192], index: 10, kind: input, shape index: {}]   ;;  %s4331_s11 = inlined_call_operand.hbm [shape: f32[32,192], index: 11, kind: input, shape index: {}]   ;;  %s4332_s12 = inlined_call_operand.hbm [shape: f32[32,192], index: 12, kind: input, shape index: {}]   ;;  %s4333_s13 = inlined_call_operand.hbm [shape: f32[32,288], index: 13, kind: input, shape index: {}]   ;;  %s4334_s14 = inlined_call_operand.hbm [shape: f32[32,64], index: 14, kind: input, shape index: {}]   ;;  %s4335_s15 = inlined_call_operand.hbm [shape: f32[1,288], index: 15, kind: input, shape index: {}]   ;;  %s4336_s16 = inlined_call_operand.hbm [shape: f32[2,8,32], index: 16, kind: output, shape index: {0}]   ;;  %s4337_s17 = inlined_call_operand.hbm [shape: f32[2,8,32], index: 17, kind: output, shape index: {1}]   ;;  %s4338_s18 = inlined_call_operand.hbm [shape: f32[2,1,32], index: 18, kind: output, shape index: {2}]   ;;  %s4339_s19 = inlined_call_operand.hbm [shape: f32[2,1,32], index: 19, kind: output, shape index: {3}]  }
   0x1   :  { %4385 = sst [smem:[#allocation54_spill]] %s4320_s0 }
   0x2   :  { %4386 = sst [smem:[#allocation55_spill]] %s4321_s1 }
   0x3   :  { %4387 = sst [smem:[#allocation56_spill]] %s4322_s2 }
   0x4   :  { %4388 = sst [smem:[#allocation57_spill]] %s4323_s3 }
   0x5   :  { %4389 = sst [smem:[#allocation58_spill]] %s4324_s4 }
   0x6   :  { %4390 = sst [smem:[#allocation59_spill]] %s4325_s5 }
   0x7   :  { %4391 = sst [smem:[#allocation60_spill]] %s4326_s6 }
   0x8   :  { %4392 = sst [smem:[#allocation61_spill]] %s4327_s7 }
   0x9   :  { %4393 = sst [smem:[#allocation62_spill]] %s4328_s8 }
   0xa   :  { %4394 = sst [smem:[#allocation63_spill]] %s4329_s9 }
   0xb   :  { %4395 = sst [smem:[#allocation64_spill]] %s4330_s10 }
   0xc   :  { %4396 = sst [smem:[#allocation65_spill]] %s4331_s11 }
   0xd   :  { %4397 = sst [smem:[#allocation66_spill]] %s4333_s13 }
   0xe   :  { %4398 = sst [smem:[#allocation67_spill]] %s4336_s16 }
   0xf   :  { %4399 = sst [smem:[#allocation68_spill]] %s4337_s17 }
  0x10   :  { %4400 = sst [smem:[#allocation69_spill]] %s4338_s18 }
  0x11   :  { %4401 = sst [smem:[#allocation70_spill]] %s4339_s19 }
  0x12   :  { %25 = vsyncpa [#allocation3], 0 }
  0x13   :  { %27 = vsyncpa [#allocation3 + $0x1], 0 }
  0x14   :  { %28 = vsyncpa [#allocation6], 0 }
  0x15   :  { %30 = vsyncpa [#allocation6 + $0x1], 0 }
  0x16   :  { %31 = vsyncpa [#allocation9], 0 }
  0x17   :  { %33 = vsyncpa [#allocation9 + $0x1], 0 }
  0x18   :  { %34 = vsyncpa [#allocation12], 0 }
  0x19   :  { %36 = vsyncpa [#allocation12 + $0x1], 0 }
  0x1a   :  { %37 = vsyncpa [#allocation15], 0 }
  0x1b   :  { %39 = vsyncpa [#allocation15 + $0x1], 0 }
  0x1c   :  { %40 = vsyncpa [#allocation18], 0 }
  0x1d   :  { %41 = vsyncpa [#allocation21], 0 }
  0x1e   :  { %42 = vsyncpa [#allocation24], 0 }
  0x1f   :  { %43 = vsyncpa [#allocation27], 0 }
  0x20   :  { %44 = vsyncpa [#allocation4], 0 }
  0x21   :  { %46 = vsyncpa [#allocation4 + $0x1], 0 }
  0x22   :  { %47 = vsyncpa [#allocation30], 0 }
  0x23   :  { %49 = vsyncpa [#allocation30 + $0x1], 0 }
  0x24   :  { %50 = vsyncpa [#allocation33], 0 }
  0x25   :  { %52 = vsyncpa [#allocation33 + $0x1], 0  ;;  %s3481_s0 = smov 0   ;;  %s3483_s30 = smov 0  }
  0x26   :  { %s3485_s20 = smov 0   ;;  %s3487_s21 = smov 0  }
  0x27 LB: > { %4402 = sst [smem:[#allocation46_spill]] %s3335_s0  ;;  %s3349_s1 = smov [#allocation17]   ;;  %s3347_s21 = sphi %s3487_s21, %s4476_s21   ;;  %s3343_s20 = sphi %s3485_s20, %s4478_s20   ;;  %s3339_s30 = sphi %s3483_s30, %s4480_s30   ;;  %s3335_s0 = sphi %s3481_s0, %s4479_s0  }
  0x28   : > { %4403 = sst [smem:[#allocation47_spill]] %s3343_s20  ;;  %s560_s22 = sshll.u32 %s3349_s1, 4  ;;  %s3507_s22 = int_to_ptr.vmem [resolvable:$true] %s560_s22 }
  0x29   : > { %4404 = sst [smem:[#allocation48_spill]] %s3347_s21  ;;  %s3502_s2 = sadd.s32 4294967295, %s3347_s21  }
  0x2a   : > { %p2320_p0 = scmp.ge.s32.totalorder %s3347_s21, 1  ;;  %p4361_p1 = scmp.eq.s32.totalorder %s3502_s2, 0 }
  0x2b   : > { %p548_p2 = scmp.lt.s32.totalorder %s3347_s21, 3  ;;  %s3350_s24 = smov [#allocation20]  }
  0x2c   : > { %s586_s25 = sshll.u32 %s3350_s24, 4  ;;  %s3351_s26 = smov [#allocation23]   ;;  %s3522_s25 = int_to_ptr.vmem [resolvable:$true] %s586_s25 }
  0x2d   : > { %p3509_p3 = pnand %p2320_p0, %p548_p2  ;;  %s612_s27 = sshll.u32 %s3351_s26, 4  ;;  %s3524_s27 = int_to_ptr.vmem [resolvable:$true] %s612_s27 }
  0x2e   : > { %s4408_s9 = sld [smem:[#allocation63_spill]] }
  0x2f   : > { %s4405_s23 = scalar_select %p3509_p3, 1, 0 }
  0x30   : > { %p2523_p5 = pneg %p3509_p3 }
  0x31   : > { %4406 = sst [smem:[#allocation49_spill]] %s4405_s23 }
  0x32   : > { %p3518_p6 = pnand %p2523_p5, %p4361_p1 }
  0x34   : > { %s4407_s3 = scalar_select %p3518_p6, 1, 0 }
  0x35   : > { %s2691_s1 = scalar_lea.hbm %s4408_s9, 1024  ;;  %p3534_p8 = pneg %p3518_p6 }
  0x36   : > { %p2692_p7 = scmp.ne.s32.totalorder %s4408_s9, %s2691_s1  ;;  %p2698_p11 = scmp.lt.u32.totalorder %s2691_s1, %s4408_s9 }
  0x37   : > { %s4409_s24 = scalar_select %p3534_p8, 1, 0 }
  0x38   : > { %p2694_p9 = pnand %p3534_p8, %p2692_p7 }
  0x3a   : > { %p2695_p10 = pneg %p2694_p9 }
  0x3c   : > { %p2700_p12 = pnand %p2698_p11, %p2695_p10 }
  0x3e   : > { %2703 = shalt.err (!%p2700_p12)
}
  0x3f   : > { %s2704_s16 = scalar_lea.vmem %s3507_s22, 1024  ;;  %p2712_p5 = scmp.lt.s32.totalorder %s3507_s22, %s3507_s22 }
  0x40   : > { %p2705_p13 = scmp.ne.s32.totalorder %s3507_s22, %s2704_s16  ;;  %p2713_p4 = scmp.lt.s32.totalorder %s2704_s16, %s2704_s16 }
  0x42   : > { %p2707_p0 = pnand %p2705_p13, %p3534_p8  ;;  %p2714_p7 = por %p2713_p4, %p2712_p5 }
  0x44   : > { %p2708_p2 = pneg %p2707_p0 }
  0x46   : > { %p2715_p9 = pnand %p2714_p7, %p2708_p2 }
  0x48   : > { %2718 = shalt.err (!%p2715_p9)
}
  0x49   : > { %s4353_s18 = smov 256   ;;  %s4355_s17 = smov 16  }
  0x4a   : > { %2526 = dma.hbm_to_vmem [thread:$0]  (!%p3518_p6), %s4408_s9, 1024, %s3507_s22, [#allocation18], %s4353_s18, %s4353_s18, %s4355_s17  }
  0x4b   : > { %s4410_s11 = sld [smem:[#allocation65_spill]] }
  0x51   : > { %s2719_s16 = scalar_lea.hbm %s4410_s11, 1024 }
  0x52   : > { %p2720_p4 = scmp.ne.s32.totalorder %s4410_s11, %s2719_s16  ;;  %p2726_p12 = scmp.lt.u32.totalorder %s2719_s16, %s4410_s11 }
  0x54   : > { %p2722_p10 = pnand %p2720_p4, %p3534_p8 }
  0x56   : > { %p2723_p11 = pneg %p2722_p10 }
  0x58   : > { %p2728_p13 = pnand %p2726_p12, %p2723_p11 }
  0x5a   : > { %2731 = shalt.err (!%p2728_p13)
}
  0x5b   : > { %s2732_s22 = scalar_lea.vmem %s3522_s25, 1024  ;;  %p2740_p7 = scmp.lt.s32.totalorder %s3522_s25, %s3522_s25 }
  0x5c   : > { %p2733_p0 = scmp.ne.s32.totalorder %s3522_s25, %s2732_s22  ;;  %p2741_p9 = scmp.lt.s32.totalorder %s2732_s22, %s2732_s22 }
  0x5e   : > { %p2735_p2 = pnand %p2733_p0, %p3534_p8  ;;  %p2742_p4 = por %p2741_p9, %p2740_p7 }
  0x60   : > { %p2736_p5 = pneg %p2735_p2 }
  0x62   : > { %p2743_p10 = pnand %p2742_p4, %p2736_p5 }
  0x64   : > { %2746 = shalt.err (!%p2743_p10)
}
  0x65   : > { %2532 = dma.hbm_to_vmem [thread:$0]  (!%p3518_p6), %s4410_s11, 1024, %s3522_s25, [#allocation21], %s4353_s18, %s4353_s18, %s4355_s17  }
  0x66   : > { %s4411_s13 = sld [smem:[#allocation66_spill]] }
  0x6c   : > { %s2747_s28 = scalar_lea.hbm %s4411_s13, 1536 }
  0x6d   : > { %p2748_p11 = scmp.ne.s32.totalorder %s4411_s13, %s2747_s28  ;;  %p2754_p0 = scmp.lt.u32.totalorder %s2747_s28, %s4411_s13 }
  0x6f   : > { %p2750_p12 = pnand %p2748_p11, %p3534_p8 }
  0x71   : > { %p2751_p13 = pneg %p2750_p12 }
  0x73   : > { %p2756_p2 = pnand %p2754_p0, %p2751_p13 }
  0x75   : > { %2759 = shalt.err (!%p2756_p2)
}
  0x76   : > { %s2760_s25 = scalar_lea.vmem %s3524_s27, 1536  ;;  %p2768_p4 = scmp.lt.s32.totalorder %s3524_s27, %s3524_s27 }
  0x77   : > { %p2761_p5 = scmp.ne.s32.totalorder %s3524_s27, %s2760_s25  ;;  %p2769_p10 = scmp.lt.s32.totalorder %s2760_s25, %s2760_s25 }
  0x79   : > { %p2763_p7 = pnand %p2761_p5, %p3534_p8  ;;  %p2770_p11 = por %p2769_p10, %p2768_p4 }
  0x7b   : > { %p2764_p9 = pneg %p2763_p7 }
  0x7d   : > { %p2771_p12 = pnand %p2770_p11, %p2764_p9 }
  0x7f   : > { %2774 = shalt.err (!%p2771_p12)
}
  0x80   : > { %s3354_s22 = smov 384   ;;  %s3355_s4 = smov 24  }
  0x81   : > { %2538 = dma.hbm_to_vmem [thread:$0]  (!%p3518_p6), %s4411_s13, 1536, %s3524_s27, [#allocation24], %s3354_s22, %s3354_s22, %s3355_s4  }
  0x82   : > { %s4352_s23 = sadd.s32 4294967294, %s3347_s21   ;;  %s3609_s28 = sadd.s32 1, %s3347_s21  }
  0x83   : > { %4412 = sst [smem:[#allocation50_spill]] %s3609_s28  ;;  %s65_s29 = sadd.s32 1, %s3343_s20 }
  0x84   : > { %s62_s1 = ssub.s32 %s3347_s21, %s3609_s28  ;;  %p72_p13 = scmp.ne.s32.totalorder %s3343_s20, %s3339_s30 }
  0x85   : > { %p63_p0 = scmp.eq.s32.totalorder %s62_s1, 0  ;;  %p73_p2 = scmp.eq.s32.totalorder %s3347_s21, 0 }
  0x86   : > { %p78_p5 = scmp.ne.s32.totalorder %s3339_s30, %s3335_s0  ;;  %p457_p7 = scmp.eq.s32.totalorder %s3502_s2, 1 }
  0x87   : > { %s3621_s26 = scalar_select %p63_p0, %s3343_s20, %s65_s29  }
  0x88   : > { %p74_p9 = por %p73_p2, %p72_p13  ;;  %p3625_p4 = por %p4361_p1, %p78_p5 }
  0x89   : > { %4413 = sst [smem:[#allocation51_spill]] %s3621_s26  ;;  %p3629_p10 = por %p457_p7, %p72_p13 }
  0x8a   : > { %s4414_s27 = scalar_select %p3625_p4, 1, 0 }
  0x8b   : > { %s4415_s16 = scalar_select %p3629_p10, 1, 0 }
  0x8c   : > { %p463_p11 = scmp.eq.s32.totalorder %s4352_s23, 1  ;;  %p2593_p12 = scmp.lt.s32.totalorder %s3347_s21, 2 }
  0x8d   : > { %4416 = sst [smem:[#allocation52_spill]] %s4415_s16  ;;  %s3637_s25 = sand.u32 1, %s3343_s20  }
  0x8e   : > { %p3639_p3 = por %p463_p11, %p78_p5  ;;  %s3644_s4 = sshll.u32 %s3637_s25, 3 }
  0x8f   : > { %s3647_s6 = sshll.u32 %s3347_s21, 7  ;;  %p3649_p13 = pnand %p2593_p12, %p74_p9 }
  0x90   : > { %s4417_s22 = scalar_select %p3639_p3, 1, 0 }
  0x91   : > { %s4419_s19 = scalar_select %p3649_p13, 1, 0 }
  0x92   : > { %4418 = sst [smem:[#allocation53_spill]] %s4417_s22  ;;  %s3654_s29 = sand.u32 1, %s3347_s21  }
  0x93   : > { %s4420_s18 = sld [smem:[#allocation55_spill]]  ;;  %s672_s9 = scalar_lea.vmem [#allocation5], %s3644_s4 }
  0x94   : > { %s679_s11 = sshll.u32 %s672_s9, 4  ;;  %p3670_p2 = pneg %p3649_p13  ;;  %s3663_s11 = int_to_ptr.vmem [resolvable:$true] %s679_s11 }
  0x96   : > { %s4421_s20 = scalar_select %p3670_p2, 1, 0 }
  0x99   : > { %s3660_s17 = scalar_lea.hbm %s4420_s18, %s3647_s6  ;;  %s2780_s28 = scalar_lea.hbm %s4420_s18, 256 }
  0x9a   : > { %s2775_s26 = scalar_lea.hbm %s3660_s17, 128  ;;  %p2781_p9 = scmp.lt.u32.totalorder %s3660_s17, %s4420_s18 }
  0x9b   : > { %p2776_p0 = scmp.ne.s32.totalorder %s3660_s17, %s2775_s26  ;;  %p2782_p11 = scmp.lt.u32.totalorder %s2780_s28, %s2775_s26 }
  0x9c   : > { %p2784_p1 = scmp.lt.u32.totalorder %s2775_s26, %s3660_s17 }
  0x9d   : > { %p2778_p5 = pnand %p3670_p2, %p2776_p0  ;;  %p2783_p12 = por %p2782_p11, %p2781_p9 }
  0x9f   : > { %p2779_p7 = pneg %p2778_p5  ;;  %p2785_p3 = por %p2784_p1, %p2783_p12 }
  0xa1   : > { %p2786_p10 = pnand %p2785_p3, %p2779_p7 }
  0xa3   : > { %2789 = shalt.err (!%p2786_p10)
}
  0xa4   : > { %s2790_s13 = scalar_lea.vmem %s3663_s11, 128  ;;  %s3356_s23 = smov [#allocation5]  }
  0xa5   : > { %p2791_p0 = scmp.ne.s32.totalorder %s3663_s11, %s2790_s13  ;;  %s2795_s1 = sshll.u32 %s3356_s23, 4  ;;  %s2796_s1 = int_to_ptr.vmem [resolvable:$false] %s2795_s1 }
  0xa6   : > { %s2797_s22 = scalar_lea.vmem %s2796_s1, 256  ;;  %p2798_p6 = scmp.lt.s32.totalorder %s3663_s11, %s2796_s1 }
  0xa7   : > { %p2793_p5 = pnand %p2791_p0, %p3670_p2  ;;  %p2799_p8 = scmp.lt.s32.totalorder %s2797_s22, %s2790_s13 }
  0xa9   : > { %p2794_p4 = pneg %p2793_p5  ;;  %p2800_p9 = por %p2799_p8, %p2798_p6 }
  0xab   : > { %p2801_p11 = pnand %p2800_p9, %p2794_p4 }
  0xad   : > { %2804 = shalt.err (!%p2801_p11)
}
  0xae   : > { %s4422_s28 = scalar_lea.sflag [#allocation6], %s3654_s29  ;;  %s4423_s23 = sld [smem:[#allocation57_spill]] }
  0xaf   : > { %2551 = dma.hbm_to_vmem [thread:$0]  (!%p3649_p13), %s3660_s17, 128, %s3663_s11, %s4422_s28  }
  0xb0   : > { %s708_s13 = scalar_lea.vmem [#allocation8], %s3644_s4 }
  0xb1   : > { %s715_s1 = sshll.u32 %s708_s13, 4  ;;  %s716_s1 = int_to_ptr.vmem [resolvable:$true] %s715_s1 }
  0xb4   : > { %s3699_s18 = scalar_lea.hbm %s4423_s23, %s3647_s6  ;;  %s2810_s17 = scalar_lea.hbm %s4423_s23, 256 }
  0xb5   : > { %s2805_s0 = scalar_lea.hbm %s3699_s18, 128  ;;  %p2811_p8 = scmp.lt.u32.totalorder %s3699_s18, %s4423_s23 }
  0xb6   : > { %p2806_p1 = scmp.ne.s32.totalorder %s3699_s18, %s2805_s0  ;;  %p2812_p4 = scmp.lt.u32.totalorder %s2810_s17, %s2805_s0 }
  0xb7   : > { %p2814_p7 = scmp.lt.u32.totalorder %s2805_s0, %s3699_s18 }
  0xb8   : > { %p2808_p3 = pnand %p2806_p1, %p3670_p2  ;;  %p2813_p10 = por %p2812_p4, %p2811_p8 }
  0xba   : > { %p2809_p6 = pneg %p2808_p3  ;;  %p2815_p12 = por %p2814_p7, %p2813_p10 }
  0xbc   : > { %p2816_p0 = pnand %p2815_p12, %p2809_p6 }
  0xbe   : > { %2819 = shalt.err (!%p2816_p0)
}
  0xbf   : > { %s2820_s9 = scalar_lea.vmem %s716_s1, 128  ;;  %s3357_s13 = smov [#allocation8]  }
  0xc0   : > { %p2821_p5 = scmp.ne.s32.totalorder %s716_s1, %s2820_s9  ;;  %s2825_s22 = sshll.u32 %s3357_s13, 4  ;;  %s2826_s22 = int_to_ptr.vmem [resolvable:$false] %s2825_s22 }
  0xc1   : > { %s2827_s16 = scalar_lea.vmem %s2826_s22, 256  ;;  %p2828_p1 = scmp.lt.s32.totalorder %s716_s1, %s2826_s22 }
  0xc2   : > { %p2823_p9 = pnand %p2821_p5, %p3670_p2  ;;  %p2829_p3 = scmp.lt.s32.totalorder %s2827_s16, %s2820_s9 }
  0xc4   : > { %p2824_p11 = pneg %p2823_p9  ;;  %p2830_p13 = por %p2829_p3, %p2828_p1 }
  0xc6   : > { %p2831_p4 = pnand %p2830_p13, %p2824_p11 }
  0xc8   : > { %2834 = shalt.err (!%p2831_p4)
}
  0xc9   : > { %p4424_p8 = scmp.ne.s32.totalorder %s4419_s19, 0  ;;  %s4425_s0 = scalar_lea.sflag [#allocation9], %s3654_s29 }
  0xca   : > { %s4426_s5 = sld [smem:[#allocation59_spill]]  ;;  %s744_s22 = scalar_lea.vmem [#allocation11], %s3644_s4 }
  0xcb   : > { %2557 = dma.hbm_to_vmem [thread:$0]  (!%p4424_p8), %s3699_s18, 128, %s716_s1, %s4425_s0  }
  0xcc   : > { %s751_s26 = sshll.u32 %s744_s22, 4  ;;  %s752_s26 = int_to_ptr.vmem [resolvable:$true] %s751_s26 }
  0xd0   : > { %s3726_s28 = scalar_lea.hbm %s4426_s5, %s3647_s6  ;;  %s2840_s1 = scalar_lea.hbm %s4426_s5, 256 }
  0xd1   : > { %s2835_s13 = scalar_lea.hbm %s3726_s28, 128  ;;  %p2841_p7 = scmp.lt.u32.totalorder %s3726_s28, %s4426_s5 }
  0xd2   : > { %p2836_p13 = scmp.ne.s32.totalorder %s3726_s28, %s2835_s13  ;;  %p2842_p12 = scmp.lt.u32.totalorder %s2840_s1, %s2835_s13 }
  0xd3   : > { %p2844_p5 = scmp.lt.u32.totalorder %s2835_s13, %s3726_s28 }
  0xd4   : > { %p2838_p6 = pnand %p2836_p13, %p3670_p2  ;;  %p2843_p0 = por %p2842_p12, %p2841_p7 }
  0xd6   : > { %p2839_p10 = pneg %p2838_p6  ;;  %p2845_p9 = por %p2844_p5, %p2843_p0 }
  0xd8   : > { %p2846_p11 = pnand %p2845_p9, %p2839_p10 }
  0xda   : > { %2849 = shalt.err (!%p2846_p11)
}
  0xdb   : > { %s2850_s17 = scalar_lea.vmem %s752_s26, 128  ;;  %s3358_s22 = smov [#allocation11]  }
  0xdc   : > { %p2851_p1 = scmp.ne.s32.totalorder %s752_s26, %s2850_s17  ;;  %s2855_s9 = sshll.u32 %s3358_s22, 4  ;;  %s2856_s9 = int_to_ptr.vmem [resolvable:$false] %s2855_s9 }
  0xdd   : > { %s2857_s16 = scalar_lea.vmem %s2856_s9, 256  ;;  %p2858_p13 = scmp.lt.s32.totalorder %s752_s26, %s2856_s9 }
  0xde   : > { %p2853_p3 = pnand %p2851_p1, %p3670_p2  ;;  %p2859_p6 = scmp.lt.s32.totalorder %s2857_s16, %s2850_s17 }
  0xe0   : > { %p2854_p4 = pneg %p2853_p3  ;;  %p2860_p8 = por %p2859_p6, %p2858_p13 }
  0xe2   : > { %p2861_p7 = pnand %p2860_p8, %p2854_p4 }
  0xe4   : > { %2864 = shalt.err (!%p2861_p7)
}
  0xe5   : > { %p4427_p12 = scmp.ne.s32.totalorder %s4419_s19, 0  ;;  %s4428_s13 = scalar_lea.sflag [#allocation12], %s3654_s29 }
  0xe6   : > { %s2343_s18 = sshll.u32 %s3347_s21, 4  ;;  %s4429_s7 = sld [smem:[#allocation61_spill]] }
  0xe7   : > { %2563 = dma.hbm_to_vmem [thread:$0]  (!%p4427_p12), %s3726_s28, 128, %s752_s26, %s4428_s13  }
  0xe8   : > { %s779_s9 = scalar_lea.vmem [#allocation14], %s3637_s25  ;;  %s4430_s8 = sld [smem:[#allocation62_spill]] }
  0xe9   : > { %s786_s17 = sshll.u32 %s779_s9, 4  ;;  %s4378_s28 = scalar_lea.sflag [#allocation15], %s3654_s29  ;;  %s3756_s17 = int_to_ptr.vmem [resolvable:$true] %s786_s17 }
  0xec   : > { %s3753_s11 = scalar_lea.hbm %s4429_s7, %s2343_s18  ;;  %s2870_s0 = scalar_lea.hbm %s4429_s7, 32 }
  0xed   : > { %s2865_s26 = scalar_lea.hbm %s3753_s11, 16  ;;  %p2871_p5 = scmp.lt.u32.totalorder %s3753_s11, %s4429_s7 }
  0xee   : > { %s3761_s5 = scalar_lea.hbm %s4430_s8, %s2343_s18  ;;  %p2866_p8 = scmp.ne.s32.totalorder %s3753_s11, %s2865_s26 }
  0xef   : > { %p2872_p9 = scmp.lt.u32.totalorder %s2870_s0, %s2865_s26  ;;  %p2874_p1 = scmp.lt.u32.totalorder %s2865_s26, %s3753_s11 }
  0xf0   : > { %p2868_p10 = pnand %p2866_p8, %p3670_p2 }
  0xf1   : > { %p2873_p11 = por %p2872_p9, %p2871_p5 }
  0xf2   : > { %p2869_p0 = pneg %p2868_p10 }
  0xf3   : > { %p2875_p3 = por %p2874_p1, %p2873_p11 }
  0xf5   : > { %p2876_p4 = pnand %p2875_p3, %p2869_p0 }
  0xf7   : > { %2879 = shalt.err (!%p2876_p4)
}
  0xf8   : > { %s2880_s18 = scalar_lea.vmem %s3756_s17, 16  ;;  %s3359_s9 = smov [#allocation14]  }
  0xf9   : > { %p2881_p13 = scmp.ne.s32.totalorder %s3756_s17, %s2880_s18  ;;  %s2885_s22 = sshll.u32 %s3359_s9, 4  ;;  %s2886_s22 = int_to_ptr.vmem [resolvable:$false] %s2885_s22 }
  0xfa   : > { %s2887_s21 = scalar_lea.vmem %s2886_s22, 32  ;;  %p2888_p8 = scmp.lt.s32.totalorder %s3756_s17, %s2886_s22 }
  0xfb   : > { %p2883_p6 = pnand %p2881_p13, %p3670_p2  ;;  %p2889_p10 = scmp.lt.s32.totalorder %s2887_s21, %s2880_s18 }
  0xfd   : > { %p2884_p7 = pneg %p2883_p6  ;;  %p2890_p5 = por %p2889_p10, %p2888_p8 }
  0xff   : > { %p2891_p9 = pnand %p2890_p5, %p2884_p7 }
 0x101   : > { %2894 = shalt.err (!%p2891_p9)
}
 0x102   : > { %2569 = dma.hbm_to_vmem [thread:$0]  (!%p4427_p12), %s3753_s11, 16, %s3756_s17, %s4378_s28  }
 0x103   : > { %s3360_s23 = smov [#allocation19]   ;;  %s3361_s26 = smov [#allocation22]  }
 0x104   : > { %s573_s16 = sshll.u32 %s3360_s23, 4  ;;  %s599_s13 = sshll.u32 %s3361_s26, 4  ;;  %s574_s16 = int_to_ptr.vmem [resolvable:$true] %s573_s16  ;;  %s3787_s13 = int_to_ptr.vmem [resolvable:$true] %s599_s13 }
 0x105   : > { %s4431_s10 = sld [smem:[#allocation64_spill]]  ;;  %p4432_p11 = scmp.ne.s32.totalorder %s4409_s24, 0 }
 0x10b   : > { %s2895_s18 = scalar_lea.hbm %s4431_s10, 1024 }
 0x10c   : > { %p2896_p0 = scmp.ne.s32.totalorder %s4431_s10, %s2895_s18  ;;  %p2902_p4 = scmp.lt.u32.totalorder %s2895_s18, %s4431_s10 }
 0x10e   : > { %p2898_p1 = pnand %p2896_p0, %p4432_p11 }
 0x110   : > { %p2899_p3 = pneg %p2898_p1 }
 0x112   : > { %p2904_p13 = pnand %p2902_p4, %p2899_p3 }
 0x114   : > { %2907 = shalt.err (!%p2904_p13)
}
 0x115   : > { %s2908_s17 = scalar_lea.vmem %s574_s16, 1024  ;;  %p2916_p10 = scmp.lt.s32.totalorder %s574_s16, %s574_s16 }
 0x116   : > { %p2909_p6 = scmp.ne.s32.totalorder %s574_s16, %s2908_s17  ;;  %p2917_p5 = scmp.lt.s32.totalorder %s2908_s17, %s2908_s17 }
 0x118   : > { %p2911_p7 = pnand %p2909_p6, %p4432_p11  ;;  %p2918_p9 = por %p2917_p5, %p2916_p10 }
 0x11a   : > { %p2912_p8 = pneg %p2911_p7 }
 0x11c   : > { %p2919_p12 = pnand %p2918_p9, %p2912_p8 }
 0x11e   : > { %2922 = shalt.err (!%p2919_p12)
}
 0x11f   : > { %p4433_p0 = scmp.ne.s32.totalorder %s4407_s3, 0  ;;  %s4434_s23 = smov 16  }
 0x120   : > { %s4435_s26 = smov 256   ;;  %s2923_s22 = scalar_lea.hbm %s4332_s12, 1024 }
 0x121   : > { %2529 = dma.hbm_to_vmem [thread:$0]  (!%p4433_p0), %s4431_s10, 1024, %s574_s16, [#allocation18], %s4435_s26, %s4435_s26, %s4434_s23  }
 0x122   : > { %p2924_p1 = scmp.ne.s32.totalorder %s4332_s12, %s2923_s22  ;;  %p2930_p4 = scmp.lt.u32.totalorder %s2923_s22, %s4332_s12 }
 0x124   : > { %p2926_p12 = pnand %p2924_p1, %p4432_p11 }
 0x126   : > { %p2927_p3 = pneg %p2926_p12 }
 0x128   : > { %p2932_p13 = pnand %p2930_p4, %p2927_p3 }
 0x12a   : > { %2935 = shalt.err (!%p2932_p13)
}
 0x12b   : > { %s2936_s16 = scalar_lea.vmem %s3787_s13, 1024  ;;  %p2944_p10 = scmp.lt.s32.totalorder %s3787_s13, %s3787_s13 }
 0x12c   : > { %p2937_p6 = scmp.ne.s32.totalorder %s3787_s13, %s2936_s16  ;;  %p2945_p5 = scmp.lt.s32.totalorder %s2936_s16, %s2936_s16 }
 0x12e   : > { %p2939_p7 = pnand %p2937_p6, %p4432_p11  ;;  %p2946_p9 = por %p2945_p5, %p2944_p10 }
 0x130   : > { %p2940_p8 = pneg %p2939_p7 }
 0x132   : > { %p2947_p1 = pnand %p2946_p9, %p2940_p8 }
 0x134   : > { %2950 = shalt.err (!%p2947_p1)
}
 0x135   : > { %2535 = dma.hbm_to_vmem [thread:$0]  (!%p4433_p0), %s4332_s12, 1024, %s3787_s13, [#allocation21], %s4435_s26, %s4435_s26, %s4434_s23  }
 0x136   : > { %s3362_s0 = smov [#allocation25]   ;;  %s2951_s21 = scalar_lea.hbm %s4334_s14, 512 }
 0x137   : > { %s625_s18 = sshll.u32 %s3362_s0, 4  ;;  %p2952_p12 = scmp.ne.s32.totalorder %s4334_s14, %s2951_s21  ;;  %s626_s18 = int_to_ptr.vmem [resolvable:$true] %s625_s18 }
 0x138   : > { %p2958_p13 = scmp.lt.u32.totalorder %s2951_s21, %s4334_s14 }
 0x139   : > { %p2954_p3 = pnand %p2952_p12, %p4432_p11 }
 0x13b   : > { %p2955_p4 = pneg %p2954_p3 }
 0x13d   : > { %p2960_p6 = pnand %p2958_p13, %p2955_p4 }
 0x13f   : > { %2963 = shalt.err (!%p2960_p6)
}
 0x140   : > { %s2964_s13 = scalar_lea.vmem %s626_s18, 512  ;;  %p2972_p5 = scmp.lt.s32.totalorder %s626_s18, %s626_s18 }
 0x141   : > { %p2965_p7 = scmp.ne.s32.totalorder %s626_s18, %s2964_s13  ;;  %p2973_p9 = scmp.lt.s32.totalorder %s2964_s13, %s2964_s13 }
 0x143   : > { %p2967_p8 = pnand %p2965_p7, %p4432_p11  ;;  %p2974_p1 = por %p2973_p9, %p2972_p5 }
 0x145   : > { %p2968_p10 = pneg %p2967_p8 }
 0x147   : > { %p2975_p2 = pnand %p2974_p1, %p2968_p10 }
 0x149   : > { %2978 = shalt.err (!%p2975_p2)
}
 0x14a   : > { %s3363_s23 = smov 128   ;;  %s3364_s26 = smov 8  }
 0x14b   : > { %2541 = dma.hbm_to_vmem [thread:$0]  (!%p4433_p0), %s4334_s14, 512, %s626_s18, [#allocation24], %s3363_s23, %s3363_s23, %s3364_s26  }
 0x14c   : > { %s3365_s1 = smov [#allocation26]   ;;  %s2979_s21 = scalar_lea.hbm %s4335_s15, 48 }
 0x14d   : > { %s639_s0 = sshll.u32 %s3365_s1, 4  ;;  %p2980_p2 = scmp.ne.s32.totalorder %s4335_s15, %s2979_s21  ;;  %s640_s0 = int_to_ptr.vmem [resolvable:$true] %s639_s0 }
 0x14e   : > { %p2986_p4 = scmp.lt.u32.totalorder %s2979_s21, %s4335_s15 }
 0x14f   : > { %p2982_p12 = pnand %p2980_p2, %p4432_p11 }
 0x151   : > { %p2983_p3 = pneg %p2982_p12 }
 0x153   : > { %p2988_p13 = pnand %p2986_p4, %p2983_p3 }
 0x155   : > { %2991 = shalt.err (!%p2988_p13)
}
 0x156   : > { %s2992_s18 = scalar_lea.vmem %s640_s0, 48  ;;  %s2999_s23 = scalar_lea.vmem %s640_s0, 64 }
 0x157   : > { %p2993_p6 = scmp.ne.s32.totalorder %s640_s0, %s2992_s18  ;;  %p3000_p10 = scmp.lt.s32.totalorder %s640_s0, %s640_s0 }
 0x158   : > { %p3001_p5 = scmp.lt.s32.totalorder %s2999_s23, %s2992_s18 }
 0x159   : > { %p2995_p7 = pnand %p2993_p6, %p4432_p11 }
 0x15a   : > { %p3002_p9 = por %p3001_p5, %p3000_p10 }
 0x15b   : > { %p2996_p8 = pneg %p2995_p7 }
 0x15d   : > { %p3003_p1 = pnand %p3002_p9, %p2996_p8 }
 0x15f   : > { %3006 = shalt.err (!%p3003_p1)
}
 0x160   : > { %2544 = dma.hbm_to_vmem [thread:$0]  (!%p4433_p0), %s4335_s15, 48, %s640_s0, [#allocation27]  }
 0x161   : > { %s4436_s1 = sld [smem:[#allocation54_spill]]  ;;  %s654_s22 = scalar_lea.vmem [#allocation2], %s3644_s4 }
 0x162   : > { %s661_s21 = sshll.u32 %s654_s22, 4  ;;  %s651_s3 = scalar_lea.sflag [#allocation3], %s3637_s25  ;;  %s662_s21 = int_to_ptr.vmem [resolvable:$true] %s661_s21 }
 0x163   : > { %p4437_p2 = scmp.ne.s32.totalorder %s4421_s20, 0 }
 0x167   : > { %s3876_s9 = scalar_lea.hbm %s4436_s1, %s3647_s6  ;;  %s3012_s16 = scalar_lea.hbm %s4436_s1, 256 }
 0x168   : > { %s3007_s11 = scalar_lea.hbm %s3876_s9, 128  ;;  %p3013_p0 = scmp.lt.u32.totalorder %s3876_s9, %s4436_s1 }
 0x169   : > { %p3008_p11 = scmp.ne.s32.totalorder %s3876_s9, %s3007_s11  ;;  %p3014_p4 = scmp.lt.u32.totalorder %s3012_s16, %s3007_s11 }
 0x16a   : > { %p3016_p6 = scmp.lt.u32.totalorder %s3007_s11, %s3876_s9 }
 0x16b   : > { %p3010_p12 = pnand %p3008_p11, %p4437_p2  ;;  %p3015_p13 = por %p3014_p4, %p3013_p0 }
 0x16d   : > { %p3011_p3 = pneg %p3010_p12  ;;  %p3017_p7 = por %p3016_p6, %p3015_p13 }
 0x16f   : > { %p3018_p8 = pnand %p3017_p7, %p3011_p3 }
 0x171   : > { %3021 = shalt.err (!%p3018_p8)
}
 0x172   : > { %s3022_s23 = scalar_lea.vmem %s662_s21, 128  ;;  %s3366_s26 = smov [#allocation2]  }
 0x173   : > { %p3023_p10 = scmp.ne.s32.totalorder %s662_s21, %s3022_s23  ;;  %s3027_s7 = sshll.u32 %s3366_s26, 4  ;;  %s3028_s7 = int_to_ptr.vmem [resolvable:$false] %s3027_s7 }
 0x174   : > { %s3029_s28 = scalar_lea.vmem %s3028_s7, 256  ;;  %p3030_p1 = scmp.lt.s32.totalorder %s662_s21, %s3028_s7 }
 0x175   : > { %p3025_p5 = pnand %p3023_p10, %p4437_p2  ;;  %p3031_p11 = scmp.lt.s32.totalorder %s3029_s28, %s3022_s23 }
 0x177   : > { %p3026_p9 = pneg %p3025_p5  ;;  %p3032_p12 = por %p3031_p11, %p3030_p1 }
 0x179   : > { %p3033_p0 = pnand %p3032_p12, %p3026_p9 }
 0x17b   : > { %3036 = shalt.err (!%p3033_p0)
}
 0x17c   : > { %p4438_p4 = scmp.ne.s32.totalorder %s4419_s19, 0  ;;  %s4439_s11 = sld [smem:[#allocation56_spill]] }
 0x17d   : > { %s690_s0 = scalar_lea.vmem [#allocation7], %s3644_s4 }
 0x17e   : > { %2548 = dma.hbm_to_vmem [thread:$0]  (!%p4438_p4), %s3876_s9, 128, %s662_s21, %s651_s3  }
 0x17f   : > { %s697_s16 = sshll.u32 %s690_s0, 4  ;;  %s698_s16 = int_to_ptr.vmem [resolvable:$true] %s697_s16 }
 0x182   : > { %s3901_s17 = scalar_lea.hbm %s4439_s11, %s3647_s6  ;;  %s3042_s9 = scalar_lea.hbm %s4439_s11, 256 }
 0x183   : > { %s3037_s13 = scalar_lea.hbm %s3901_s17, 128  ;;  %p3043_p7 = scmp.lt.u32.totalorder %s3901_s17, %s4439_s11 }
 0x184   : > { %p3038_p3 = scmp.ne.s32.totalorder %s3901_s17, %s3037_s13  ;;  %p3044_p8 = scmp.lt.u32.totalorder %s3042_s9, %s3037_s13 }
 0x185   : > { %p3046_p5 = scmp.lt.u32.totalorder %s3037_s13, %s3901_s17 }
 0x186   : > { %p3040_p13 = pnand %p3038_p3, %p4437_p2  ;;  %p3045_p10 = por %p3044_p8, %p3043_p7 }
 0x188   : > { %p3041_p6 = pneg %p3040_p13  ;;  %p3047_p9 = por %p3046_p5, %p3045_p10 }
 0x18a   : > { %p3048_p1 = pnand %p3047_p9, %p3041_p6 }
 0x18c   : > { %3051 = shalt.err (!%p3048_p1)
}
 0x18d   : > { %s3052_s26 = scalar_lea.vmem %s698_s16, 128  ;;  %s3367_s7 = smov [#allocation7]  }
 0x18e   : > { %p3053_p11 = scmp.ne.s32.totalorder %s698_s16, %s3052_s26  ;;  %s3057_s28 = sshll.u32 %s3367_s7, 4  ;;  %s3058_s28 = int_to_ptr.vmem [resolvable:$false] %s3057_s28 }
 0x18f   : > { %s3059_s24 = scalar_lea.vmem %s3058_s28, 256  ;;  %p3060_p3 = scmp.lt.s32.totalorder %s698_s16, %s3058_s28 }
 0x190   : > { %p3055_p12 = pnand %p3053_p11, %p4437_p2  ;;  %p3061_p13 = scmp.lt.s32.totalorder %s3059_s24, %s3052_s26 }
 0x192   : > { %p3056_p0 = pneg %p3055_p12  ;;  %p3062_p4 = por %p3061_p13, %p3060_p3 }
 0x194   : > { %p3063_p7 = pnand %p3062_p4, %p3056_p0 }
 0x196   : > { %3066 = shalt.err (!%p3063_p7)
}
 0x197   : > { %p4440_p8 = scmp.ne.s32.totalorder %s4419_s19, 0  ;;  %s4441_s22 = scalar_lea.sflag [#allocation6], %s3654_s29 }
 0x198   : > { %s4442_s18 = sld [smem:[#allocation58_spill]]  ;;  %s726_s9 = scalar_lea.vmem [#allocation10], %s3644_s4 }
 0x199   : > { %2554 = dma.hbm_to_vmem [thread:$0]  (!%p4440_p8), %s3901_s17, 128, %s698_s16, %s4441_s22  }
 0x19a   : > { %s733_s21 = sshll.u32 %s726_s9, 4  ;;  %s734_s21 = int_to_ptr.vmem [resolvable:$true] %s733_s21 }
 0x19e   : > { %s3927_s23 = scalar_lea.hbm %s4442_s18, %s3647_s6  ;;  %s3072_s17 = scalar_lea.hbm %s4442_s18, 256 }
 0x19f   : > { %s3067_s3 = scalar_lea.hbm %s3927_s23, 128  ;;  %p3073_p5 = scmp.lt.u32.totalorder %s3927_s23, %s4442_s18 }
 0x1a0   : > { %p3068_p4 = scmp.ne.s32.totalorder %s3927_s23, %s3067_s3  ;;  %p3074_p9 = scmp.lt.u32.totalorder %s3072_s17, %s3067_s3 }
 0x1a1   : > { %p3076_p11 = scmp.lt.u32.totalorder %s3067_s3, %s3927_s23 }
 0x1a2   : > { %p3070_p6 = pnand %p3068_p4, %p4437_p2  ;;  %p3075_p1 = por %p3074_p9, %p3073_p5 }
 0x1a4   : > { %p3071_p10 = pneg %p3070_p6  ;;  %p3077_p12 = por %p3076_p11, %p3075_p1 }
 0x1a6   : > { %p3078_p0 = pnand %p3077_p12, %p3071_p10 }
 0x1a8   : > { %3081 = shalt.err (!%p3078_p0)
}
 0x1a9   : > { %s3082_s24 = scalar_lea.vmem %s734_s21, 128  ;;  %s3368_s22 = smov [#allocation10]  }
 0x1aa   : > { %p3083_p3 = scmp.ne.s32.totalorder %s734_s21, %s3082_s24  ;;  %s3087_s0 = sshll.u32 %s3368_s22, 4  ;;  %s3088_s0 = int_to_ptr.vmem [resolvable:$false] %s3087_s0 }
 0x1ab   : > { %s3089_s13 = scalar_lea.vmem %s3088_s0, 256  ;;  %p3090_p4 = scmp.lt.s32.totalorder %s734_s21, %s3088_s0 }
 0x1ac   : > { %p3085_p13 = pnand %p3083_p3, %p4437_p2  ;;  %p3091_p6 = scmp.lt.s32.totalorder %s3089_s13, %s3082_s24 }
 0x1ae   : > { %p3086_p7 = pneg %p3085_p13  ;;  %p3092_p8 = por %p3091_p6, %p3090_p4 }
 0x1b0   : > { %p3093_p5 = pnand %p3092_p8, %p3086_p7 }
 0x1b2   : > { %3096 = shalt.err (!%p3093_p5)
}
 0x1b3   : > { %p4443_p9 = scmp.ne.s32.totalorder %s4419_s19, 0  ;;  %s4444_s9 = scalar_lea.sflag [#allocation9], %s3654_s29 }
 0x1b4   : > { %s4445_s7 = sld [smem:[#allocation60_spill]]  ;;  %s762_s16 = scalar_lea.vmem [#allocation13], %s3644_s4 }
 0x1b5   : > { %2560 = dma.hbm_to_vmem [thread:$0]  (!%p4443_p9), %s3927_s23, 128, %s734_s21, %s4444_s9  }
 0x1b6   : > { %s769_s28 = sshll.u32 %s762_s16, 4  ;;  %s770_s28 = int_to_ptr.vmem [resolvable:$true] %s769_s28 }
 0x1ba   : > { %s3953_s17 = scalar_lea.hbm %s4445_s7, %s3647_s6  ;;  %s3102_s23 = scalar_lea.hbm %s4445_s7, 256 }
 0x1bb   : > { %s3097_s24 = scalar_lea.hbm %s3953_s17, 128  ;;  %p3103_p11 = scmp.lt.u32.totalorder %s3953_s17, %s4445_s7 }
 0x1bc   : > { %p3098_p8 = scmp.ne.s32.totalorder %s3953_s17, %s3097_s24  ;;  %p3104_p12 = scmp.lt.u32.totalorder %s3102_s23, %s3097_s24 }
 0x1bd   : > { %p3106_p3 = scmp.lt.u32.totalorder %s3097_s24, %s3953_s17 }
 0x1be   : > { %p3100_p10 = pnand %p3098_p8, %p4437_p2  ;;  %p3105_p0 = por %p3104_p12, %p3103_p11 }
 0x1c0   : > { %p3101_p1 = pneg %p3100_p10  ;;  %p3107_p13 = por %p3106_p3, %p3105_p0 }
 0x1c2   : > { %p3108_p7 = pnand %p3107_p13, %p3101_p1 }
 0x1c4   : > { %3111 = shalt.err (!%p3108_p7)
}
 0x1c5   : > { %s3112_s4 = scalar_lea.vmem %s770_s28, 128  ;;  %s3369_s6 = smov [#allocation13]  }
 0x1c6   : > { %p3113_p4 = scmp.ne.s32.totalorder %s770_s28, %s3112_s4  ;;  %s3117_s9 = sshll.u32 %s3369_s6, 4  ;;  %s3118_s9 = int_to_ptr.vmem [resolvable:$false] %s3117_s9 }
 0x1c7   : > { %s3119_s3 = scalar_lea.vmem %s3118_s9, 256  ;;  %p3120_p8 = scmp.lt.s32.totalorder %s770_s28, %s3118_s9 }
 0x1c8   : > { %p3115_p6 = pnand %p3113_p4, %p4437_p2  ;;  %p3121_p10 = scmp.lt.s32.totalorder %s3119_s3, %s3112_s4 }
 0x1ca   : > { %p3116_p5 = pneg %p3115_p6  ;;  %p3122_p9 = por %p3121_p10, %p3120_p8 }
 0x1cc   : > { %p3123_p11 = pnand %p3122_p9, %p3116_p5 }
 0x1ce   : > { %3126 = shalt.err (!%p3123_p11)
}
 0x1cf   : > { %p4446_p12 = scmp.ne.s32.totalorder %s4419_s19, 0  ;;  %s4447_s26 = scalar_lea.sflag [#allocation12], %s3654_s29 }
 0x1d0   : > { %s796_s16 = scalar_lea.vmem [#allocation16], %s3637_s25  ;;  %s3127_s22 = scalar_lea.hbm %s3761_s5, 16 }
 0x1d1   : > { %2566 = dma.hbm_to_vmem [thread:$0]  (!%p4446_p12), %s3953_s17, 128, %s770_s28, %s4447_s26  }
 0x1d2   : > { %s803_s24 = sshll.u32 %s796_s16, 4  ;;  %p3128_p1 = scmp.ne.s32.totalorder %s3761_s5, %s3127_s22  ;;  %s804_s24 = int_to_ptr.vmem [resolvable:$true] %s803_s24 }
 0x1d3   : > { %s3132_s21 = scalar_lea.hbm %s4430_s8, 32  ;;  %p3133_p3 = scmp.lt.u32.totalorder %s3761_s5, %s4430_s8 }
 0x1d4   : > { %p3130_p9 = pnand %p3128_p1, %p4437_p2  ;;  %p3134_p13 = scmp.lt.u32.totalorder %s3132_s21, %s3127_s22 }
 0x1d5   : > { %p3136_p4 = scmp.lt.u32.totalorder %s3127_s22, %s3761_s5 }
 0x1d6   : > { %p3131_p0 = pneg %p3130_p9  ;;  %p3135_p7 = por %p3134_p13, %p3133_p3 }
 0x1d8   : > { %p3137_p6 = por %p3136_p4, %p3135_p7 }
 0x1da   : > { %p3138_p5 = pnand %p3137_p6, %p3131_p0 }
 0x1dc   : > { %3141 = shalt.err (!%p3138_p5)
}
 0x1dd   : > { %s3142_s25 = scalar_lea.vmem %s804_s24, 16  ;;  %s3370_s17 = smov [#allocation16]  }
 0x1de   : > { %p3143_p8 = scmp.ne.s32.totalorder %s804_s24, %s3142_s25  ;;  %s3147_s28 = sshll.u32 %s3370_s17, 4  ;;  %s3148_s28 = int_to_ptr.vmem [resolvable:$false] %s3147_s28 }
 0x1df   : > { %s3149_s6 = scalar_lea.vmem %s3148_s28, 32  ;;  %p3150_p1 = scmp.lt.s32.totalorder %s804_s24, %s3148_s28 }
 0x1e0   : > { %p3145_p10 = pnand %p3143_p8, %p4437_p2  ;;  %p3151_p9 = scmp.lt.s32.totalorder %s3149_s6, %s3142_s25 }
 0x1e2   : > { %p3146_p11 = pneg %p3145_p10  ;;  %p3152_p12 = por %p3151_p9, %p3150_p1 }
 0x1e4   : > { %p3153_p3 = pnand %p3152_p12, %p3146_p11 }
 0x1e6   : > { %3156 = shalt.err (!%p3153_p3)
}
 0x1e7   : > { %p4448_p13 = scmp.ne.s32.totalorder %s4419_s19, 0  ;;  %s4449_s9 = scalar_lea.sflag [#allocation15], %s3654_s29 }
 0x1e8   : > { %s4450_s3 = sld [smem:[#allocation49_spill]] }
 0x1e9   : > { %2572 = dma.hbm_to_vmem [thread:$0]  (!%p4448_p13), %s3761_s5, 16, %s804_s24, %s4449_s9  }
 0x1ee   : > { %p4451_p0 = scmp.ne.s32.totalorder %s4450_s3, 0 }
 0x1ef   : > { %s3998_s20 = sand.u32 (!%p4451_p0), 1, %s3339_s30   ;;  %p4452_p2 = scmp.ne.s32.totalorder (!%p4451_p0), %s4414_s27, 0 }
 0x1f0   : > { %812 = sbr.rel (%p4451_p0) target bundleno = 1752 (0x6d8), region = 84  ;;  %s4001_s26 = sshll.u32 (!%p4451_p0), %s3998_s20, 3 }
 0x1f1   : > { %s815_s16 = scalar_lea.sflag (!%p4451_p0), [#allocation3], %s3998_s20  ;;  %s818_s22 = scalar_lea.vmem (!%p4451_p0), [#allocation2], %s4001_s26 }
 0x1f7   : > { %3286 = dma.done.wait (%p4452_p2), %s815_s16, 128  }
 0x1f8   : > { %3288 = vsyncadd (%p4452_p2), %s815_s16, 4294967168  ;;  %s4010_s5 = sand.u32 1, %s3502_s2   ;;  %s827_s29 = scalar_lea.vmem [#allocation5], %s4001_s26 }
 0x1f9   : > { %s824_s19 = scalar_lea.sflag [#allocation6], %s4010_s5 }
 0x1fa   : > { %3290 = dma.done.wait (%p4452_p2), %s824_s19, 256  }
 0x1fb   : > { %3292 = vsyncadd (%p4452_p2), %s824_s19, 4294967040  ;;  %s836_s24 = scalar_lea.vmem [#allocation7], %s4001_s26  ;;  %s842_s0 = scalar_lea.sflag [#allocation9], %s4010_s5 }
 0x1fc   : > { %s845_s23 = scalar_lea.vmem [#allocation8], %s4001_s26 }
 0x1fd   : > { %3294 = dma.done.wait (%p4452_p2), %s842_s0, 256  }
 0x1fe   : > { %3296 = vsyncadd (%p4452_p2), %s842_s0, 4294967040  ;;  %s854_s21 = scalar_lea.vmem [#allocation10], %s4001_s26  ;;  %s860_s13 = scalar_lea.sflag [#allocation12], %s4010_s5 }
 0x1ff   : > { %s863_s4 = scalar_lea.vmem [#allocation11], %s4001_s26 }
 0x200   : > { %3298 = dma.done.wait (%p4452_p2), %s860_s13, 256  }
 0x201   : > { %3300 = vsyncadd (%p4452_p2), %s860_s13, 4294967040  ;;  %s872_s25 = scalar_lea.vmem [#allocation13], %s4001_s26  ;;  %s878_s17 = scalar_lea.sflag [#allocation15], %s4010_s5 }
 0x202   : > { %s880_s28 = scalar_lea.vmem [#allocation14], %s3998_s20 }
 0x203   : > { %3302 = dma.done.wait (%p4452_p2), %s878_s17, 32  }
 0x204   : > { %3304 = vsyncadd (%p4452_p2), %s878_s17, 4294967264  ;;  %s888_s6 = scalar_lea.vmem [#allocation16], %s3998_s20  ;;  %p4453_p12 = scmp.eq.s32.totalorder %s3502_s2, 0 }
 0x206   : > { %3306 = dma.done.wait (%p4453_p12), [#allocation18], 2048   ;;  %p4454_p7 = pmov %p4453_p12 }
 0x208   : > { %3308 = vsyncadd (%p4454_p7), [#allocation18], 4294965248  ;;  %p4455_p4 = pmov %p4454_p7 }
 0x20a   : > { %3310 = dma.done.wait (%p4455_p4), [#allocation21], 2048   ;;  %p4456_p6 = pmov %p4455_p4 }
 0x20b   : > { %p4457_p5 = pmov %p4455_p4 }
 0x20c   : > { %3312 = vsyncadd (%p4456_p6), [#allocation21], 4294965248 }
 0x20d   : > { %3314 = dma.done.wait (%p4457_p5), [#allocation24], 2048   ;;  %p4458_p8 = pmov %p4455_p4 }
 0x20e   : > { %p4459_p10 = pmov %p4455_p4 }
 0x20f   : > { %3316 = vsyncadd (%p4458_p8), [#allocation24], 4294965248 }
 0x210   : > { %3318 = dma.done.wait (%p4459_p10), [#allocation27], 48   ;;  %p4460_p11 = pmov %p4455_p4 }
 0x211   : > { %v3371_v0 = vmov 0.0|0.0   ;;  %v3372_v1 = vmov 0.0   ;;  %vm3373_vm0 = vmmov 0   ;;  %v1042_v2 = vld [vmem:[#allocation23 + $0x8] sm:$0xff]  ;;  %v1045_v3 = vld [vmem:[#allocation23 + $0x20] sm:$0xff]  ;;  %v1044_v6 = vld [vmem:[#allocation23 + $0x18] sm:$0xff] }
 0x212   : > { %3320 = vsyncadd (%p4460_p11), [#allocation27], 4294967248  ;;  %2427 = vmatprep.subr.bf16.mxu0 %v3371_v0  ;;  %1137 = vmatprep.mubr.f32.mxu1 %v3372_v1  ;;  %v1041_v4 = vld [vmem:[#allocation23] sm:$0xff]  ;;  %v2413_v5 = vpack.c.bf16 %v1045_v3, %v1042_v2  ;;  %v1215_v8 = vld [vmem:[#allocation25 + $0x8] sm:$0xff]  ;;  %vm1031_vm1 = vcmask 261120   ;;  %s3374_s27 = smov 64  }
 0x213   : > { %2410 = vmatprep.mubr.msk.f32.mxu0 %vm3373_vm0, %v3372_v1  ;;  %v1214_v7 = vld [vmem:[#allocation25] sm:$0xff]  ;;  %v2415_v9 = vpack.c.bf16 %v1044_v6, %v1041_v4  ;;  %v1048_v11 = vld [vmem:[#allocation23 + $0x38] sm:$0xff]  ;;  %v1051_v12 = vld [vmem:[#allocation23 + $0x50] sm:$0xff]  ;;  %s3375_s9 = smov 32   ;;  %vm1668_vm2 = vcmask 523264   ;;  %s3376_s3 = smov 96  }
 0x214   : > { %v2428_v10 = vpack.c.bf16 %v1215_v8, %v1214_v7  ;;  %v1047_v13 = vld [vmem:[#allocation23 + $0x30] sm:$0xff]  ;;  %2414 = vmatprep.subr.bf16.mxu1 %v2413_v5  ;;  %v2417_v14 = vpack.c.bf16 %v1051_v12, %v1048_v11  ;;  %v1050_v15 = vld [vmem:[#allocation23 + $0x48] sm:$0xff]  ;;  %v1217_v17 = vld [vmem:[#allocation25 + $0x18] sm:$0xff]  ;;  %vm1741_vm3 = vcmask 253952   ;;  %s1015_s16 = scalar_lea.vmem [#allocation31], %s3998_s20  ;;  %s1021_s19 = scalar_lea.vmem [#allocation32], %s3998_s20 }
 0x215   : > { %v1216_v16 = vld [vmem:[#allocation25 + $0x10] sm:$0xff]  ;;  %2416 = vmatpush1.bf16.msra.mxu1 %v2415_v9  ;;  %v2419_v18 = vpack.c.bf16 %v1050_v15, %v1047_v13  ;;  %v1389_v20 = vld [vmem:[#allocation20 + $0x8] sm:$0xff]  ;;  %v1391_v21 = vld [vmem:[#allocation20 + $0x18] sm:$0xff]  ;;  %s1931_s13 = sshll.u32 %s1021_s19, 4  ;;  %s3377_s17 = smov [#allocation32]   ;;  %s4170_s13 = int_to_ptr.vmem [resolvable:$true] %s1931_s13 }
 0x216   : > { %2429 = vmatpush3.bf16.msra.mxu0 %v2428_v10  ;;  %v2431_v19 = vpack.c.bf16 %v1217_v17, %v1216_v16  ;;  %2418 = vmatprep.subr.bf16.mxu1 %v2417_v14  ;;  %v2441_v22 = vpack.c.bf16 %v1391_v21, %v1389_v20  ;;  %v4061_v23 = vld [vmem:[%s836_s24] sm:$0xff]  ;;  %v1049_v32 = vld [vmem:[#allocation23 + $0x40] sm:$0xff] }
 0x217   : > { %2430 = vmatprep.subr.bf16.mxu0 %v3371_v0  ;;  %v1032_v24 = vsel %vm1031_vm1, %v4061_v23, 0.0  ;;  %v1030_v26 = vld [vmem:[%s888_s6] sm:$0x1]  ;;  %v1043_v28 = vld [vmem:[#allocation23 + $0x10] sm:$0xff]  ;;  %v1052_v33 = vld [vmem:[#allocation23 + $0x58] sm:$0xff] }
 0x218   : > { %v1033_v25 = vrot.slane %v1032_v24, 4  ;;  %v1046_v29 = vld [vmem:[#allocation23 + $0x28] sm:$0xff]  ;;  %v1388_v35 = vld [vmem:[#allocation20] sm:$0xff]  ;;  %v2425_v36 = vpack.c.bf16 %v1052_v33, %v1049_v32  ;;  %v1390_v37 = vld [vmem:[#allocation20 + $0x10] sm:$0xff] }
 0x219   : > { %2420 = vmatpush1.bf16.msra.mxu1 %v2419_v18  ;;  %v2422_v31 = vpack.c.bf16 %v1046_v29, %v1043_v28  ;;  %v1393_v38 = vld [vmem:[#allocation20 + $0x28] sm:$0xff]  ;;  %v1395_v39 = vld [vmem:[#allocation20 + $0x38] sm:$0xff]  ;;  %v1298_v43 = vld [vmem:[#allocation17] sm:$0xff]  ;;  %v2443_v50 = vpack.c.bf16 %v1390_v37, %v1388_v35 }
 0x21a   : > { %2432 = vmatpush3.bf16.msra.mxu0 %v2431_v19  ;;  %v1034_v27 = vadd.f32 %v1033_v25, %v1032_v24  ;;  %2421 = vmatprep.subr.bf16.mxu1 %v3371_v0  ;;  %v1299_v41 = vld [vmem:[#allocation17 + $0x8] sm:$0xff]  ;;  %v1301_v42 = vld [vmem:[#allocation17 + $0x18] sm:$0xff]  ;;  %v1300_v45 = vld [vmem:[#allocation17 + $0x10] sm:$0xff]  ;;  %v2445_v54 = vpack.c.bf16 %v1395_v39, %v1393_v38  ;;  %v1055_v24 = vlaneseq }
 0x21b   : > { %2442 = vmatprep.subr.bf16.mxu0 %v2441_v22  ;;  %v2433_v44 = vpack.c.bf16 %v1301_v42, %v1299_v41  ;;  %v1303_v46 = vld [vmem:[#allocation17 + $0x28] sm:$0xff]  ;;  %v1305_v47 = vld [vmem:[#allocation17 + $0x38] sm:$0xff]  ;;  %v2435_v49 = vpack.c.bf16 %v1300_v45, %v1298_v43  ;;  %v1302_v51 = vld [vmem:[#allocation17 + $0x20] sm:$0xff] }
 0x21c   : > { %2362 = vmatmul.mubr.msk.f32.vlgmr.msra.gmra.mrb[0].mxu1 %vm1031_vm1, %v1030_v26  ;;  %v1035_v30 = vrot.slane %v1034_v27, 2  ;;  %v1304_v52 = vld [vmem:[#allocation17 + $0x30] sm:$0xff]  ;;  %v1392_v55 = vld [vmem:[#allocation20 + $0x20] sm:$0xff]  ;;  %v2437_v57 = vpack.c.bf16 %v1305_v47, %v1303_v46  ;;  %v1381_v58 = vld [vmem:[#allocation19 + $0x8] sm:$0xff]  ;;  %v1056_v25 = vshrl.u32 %v1055_v24, 7 }
 0x21d   : > { %2399 = vmatprep.mubr.msk.f32.mxu1 %vm3373_vm0, %v3372_v1  ;;  %2423 = vmatpush3.bf16.msra.mxu1 %v2422_v31  ;;  %v1394_v56 = vld [vmem:[#allocation20 + $0x30] sm:$0xff]  ;;  %v1383_v59 = vld [vmem:[#allocation19 + $0x18] sm:$0xff]  ;;  %v2439_v60 = vpack.c.bf16 %v1304_v52, %v1302_v51  ;;  %v1380_v63 = vld [vmem:[#allocation19] sm:$0xff] }
 0x21e   : > { %v1036_v34 = vadd.f32 %v1035_v30, %v1034_v27  ;;  %2424 = vmatprep.subr.bf16.mxu1 %v3371_v0  ;;  %v2447_v61 = vpack.c.bf16 %v1394_v56, %v1392_v55  ;;  %v2449_v62 = vpack.c.bf16 %v1383_v59, %v1381_v58  ;;  %v1382_v0 = vld [vmem:[#allocation19 + $0x10] sm:$0xff]  ;;  %v1385_v2 = vld [vmem:[#allocation19 + $0x28] sm:$0xff]  ;;  %v1387_v3 = vld [vmem:[#allocation19 + $0x38] sm:$0xff]  ;;  %v4090_v29 = vsub.s32 0, %v1056_v25 }
 0x21f   : > { %v1028_v4 = vld [vmem:[%s872_s25] sm:$0xff]  ;;  %v2451_v5 = vpack.c.bf16 %v1382_v0, %v1380_v63  ;;  %v2453_v6 = vpack.c.bf16 %v1387_v3, %v1385_v2  ;;  %v1384_v7 = vld [vmem:[#allocation19 + $0x20] sm:$0xff]  ;;  %v1065_v33 = vsub.s32 2, %v1056_v25  ;;  %s3157_s25 = scalar_lea.vmem %s4170_s13, 16 }
 0x220   : > { %v1037_v40 = vrot.slane %v1036_v34, 1  ;;  %v1386_v8 = vld [vmem:[#allocation19 + $0x30] sm:$0xff]  ;;  %v1545_v9 = vld [vmem:[#allocation22 + $0x8] sm:$0xff]  ;;  %v1547_v10 = vld [vmem:[#allocation22 + $0x18] sm:$0xff]  ;;  %p3158_p1 = scmp.ne.s32.totalorder %s4170_s13, %s3157_s25 }
 0x221   : > { %2426 = vmatpush3.bf16.msra.mxu1 %v2425_v36  ;;  %v2455_v11 = vpack.c.bf16 %v1386_v8, %v1384_v7  ;;  %v2457_v12 = vpack.c.bf16 %v1547_v10, %v1545_v9  ;;  %v1544_v13 = vld [vmem:[#allocation22] sm:$0xff]  ;;  %v1546_v14 = vld [vmem:[#allocation22 + $0x10] sm:$0xff]  ;;  %v1549_v15 = vld [vmem:[#allocation22 + $0x28] sm:$0xff] }
 0x222   : > { %v1038_v48 = vadd.f32 %v1037_v40, %v1036_v34  ;;  %2434 = vmatprep.subr.bf16.mxu1 %v2433_v44  ;;  %v1551_v16 = vld [vmem:[#allocation22 + $0x38] sm:$0xff]  ;;  %v2459_v18 = vpack.c.bf16 %v1546_v14, %v1544_v13  ;;  %v1548_v20 = vld [vmem:[#allocation22 + $0x20] sm:$0xff]  ;;  %v1550_v21 = vld [vmem:[#allocation22 + $0x30] sm:$0xff] }
 0x223   : > { %v1027_v17 = vld [vmem:[%s863_s4] sm:$0xff]  ;;  %v2461_v19 = vpack.c.bf16 %v1551_v16, %v1549_v15  ;;  %v2463_v22 = vpack.c.bf16 %v1550_v21, %v1548_v20  ;;  %s1880_s4 = scalar_lea.sflag [#allocation33], %s3998_s20 }
 0x224   : > { %v1040_v53 = vmul.f32 0.125, %v1038_v48  ;;  %2400 = vmatmul.mubr.msk.f32.vlgmr.msra.gmra.mrb[2].mxu1 %vm1031_vm1, %v1030_v26  ;;  %v1061_v26 = vsub.s32 1, %v1056_v25  ;;  %v1053_v27 = vld [vmem:[#allocation26] sm:$0x7] }
 0x225   : > { %2436 = vmatpush1.bf16.msra.mxu1 %v2435_v49  ;;  %1373 = vmatprep.mubr.f32.mxu1 %v3372_v1  ;;  %v1066_v35 = vrot.slane %v1053_v27, %v1065_v33 }
 0x226   : > { %2411 = vmatmul.mubr.msk.f32.vlgmr.msra.gmra.mrb[0].mxu0 %vm1031_vm1, %v1040_v53  ;;  %2438 = vmatprep.subr.bf16.mxu1 %v2437_v57  ;;  %v1062_v28 = vrot.slane %v1053_v27, %v1061_v26 }
 0x227   : > { %2444 = vmatpush1.bf16.msra.mxu0 %v2443_v50  ;;  %1463 = vmatprep.mubr.f32.mxu0 %v3372_v1 }
 0x228   : > { %2446 = vmatprep.subr.bf16.mxu0 %v2445_v54 }
 0x229   : > { %2440 = vmatpush1.bf16.msra.mxu1 %v2439_v60 }
 0x22b   : > { %2448 = vmatpush1.bf16.msra.mxu0 %v2447_v61 }
 0x22c   : > { %2450 = vmatprep.subr.bf16.mxu0 %v2449_v62  ;;  %2366 = vmatmul.mubr.msk.f32.vlgmr.msra.gmra.mrb[4].mxu1 %vm1031_vm1, %v4061_v23  ;;  %v4086_v23 = vld [vmem:[%s818_s22] sm:$0xff]  ;;  %s4461_s22 = sld [smem:[#allocation52_spill]] }
 0x22e   : > { %2367 = vmatmul.mubr.msk.f32.vlgmr.msra.gmra.mrb[2].mxu0 %vm1031_vm1, %v1028_v4 }
 0x22f   : > { %2452 = vmatpush1.bf16.msra.mxu0 %v2451_v5  ;;  %1537 = vmatprep.mubr.f32.mxu0 %v3372_v1 }
 0x230   : > { %2454 = vmatprep.subr.bf16.mxu0 %v2453_v6 }
 0x232   : > { %p4463_p9 = scmp.ne.s32.totalorder %s4461_s22, 0 }
 0x233   : > { %2456 = vmatpush1.bf16.msra.mxu0 %v2455_v11 }
 0x234   : > { %2458 = vmatprep.subr.bf16.mxu0 %v2457_v12  ;;  %p3159_p3 = pnand %p3158_p1, %p4463_p9 }
 0x236   : > { %2368 = vmatmul.mubr.msk.f32.vlgmr.msra.gmra.mrb[2].mxu0 %vm1031_vm1, %v1027_v17  ;;  %p3160_p13 = pneg %p3159_p3 }
 0x237   : > { %2460 = vmatpush1.bf16.msra.mxu0 %v2459_v18  ;;  %1619 = vmatprep.mubr.f32.mxu0 %v3372_v1  ;;  %v1058_v1 = vrot.slane %v1053_v27, %v4090_v29 }
 0x238   : > { %2462 = vmatprep.subr.bf16.mxu0 %v2461_v19 }
 0x23b   : > { %2464 = vmatpush1.bf16.msra.mxu0 %v2463_v22 }
 0x23e   : > { %2369 = vmatmul.mubr.msk.f32.vlgmr.msra.gmra.mrb[2].mxu0 %vm1031_vm1, %v4086_v23 }
 0x2ef   : > { %v1139_v30 = vpop.f32.mrb[0].mxu1 }
 0x2f0   : > { %v1141_v31 = vpop.f32.mrb[1].mxu1  ;;  %v1140_v36 = vadd.f32 %v1139_v30, %v1058_v1 }
 0x2f1   : > { %v1142_v32 = vadd.f32 %v1141_v31, %v1062_v28 }
 0x2f2   : > { %v1631_v48 = vrot.slane %v1140_v36, %v4090_v29 }
 0x2f3   : > { %v1657_v34 = vrot.slane %v1142_v32, %v4090_v29 }
 0x2f5   : > { %1664 = vrot.lane.b32.xlu1 %v1657_v34, %s3374_s27 }
 0x2f7   : > { %v1210_v37 = vpop.f32.mrb[2].mxu1 }
 0x2f8   : > { %v1211_v39 = vadd.f32 %v1210_v37, %v1066_v35  ;;  %v2401_v40 = vpop.f32.mrb[3].mxu1 }
 0x2f9   : > { %v1287_v38 = vpop.f32.mrb[0].mxu0 }
 0x2fa   : > { %v1291_v41 = vadd.f32 %v1287_v38, %v1140_v36  ;;  %v2412_v42 = vpop.f32.mrb[1].mxu0  ;;  %v1661_v43 = vrot.slane %v1211_v39, %v4090_v29 }
 0x2fc   : > { %1666 = vrot.lane.b32.xlu1 %v1661_v43, %s3374_s27  ;;  %v2365_v2 = vmul.f32 -1.442695, %v1291_v41  ;;  %v1023_v41 = vld [vmem:[%s827_s29] sm:$0xff]  ;;  %s4381_s29 = sshll.u32 %s3502_s2, 4 }
 0x2ff   : > { %v1375_v44 = vpop.f32.mrb[4].mxu1 }
 0x300   : > { %v1377_v45 = vpop.f32.mrb[5].mxu1 }
 0x311   : > { %v1621_v46 = vpop.f32.mrb[2].mxu0 }
 0x312   : > { %1645 = vrot.lane.b32.xlu0 %v1621_v46, %s3375_s9  ;;  %v1623_v47 = vpop.f32.mrb[3].mxu0 }
 0x316   : > { %1647 = vrot.lane.b32.xlu0 %v1623_v47, %s3375_s9 }
 0x31a   : > { %1633 = vrot.lane.b32.xlu0 %v1631_v48, %s3374_s27 }
 0x367   : > { %v1665_v49 = vpop.permute.xlu1 %1664 }
 0x36e   : > { %v1667_v51 = vpop.permute.xlu1 %1666 }
 0x36f   : > { %v1670_v55 = vsel %vm1668_vm2, %v1665_v49, %v1667_v51  ;;  %v1029_v51 = vld [vmem:[%s880_s28] sm:$0x1]  ;;  %s3161_s28 = sshll.u32 %s3377_s17, 4  ;;  %s3162_s28 = int_to_ptr.vmem [resolvable:$false] %s3161_s28 }
 0x370   : > { %s3163_s6 = scalar_lea.vmem %s3162_s28, 32  ;;  %p3164_p0 = scmp.lt.s32.totalorder %s4170_s13, %s3162_s28 }
 0x371   : > { %p3165_p2 = scmp.lt.s32.totalorder %s3163_s6, %s3157_s25 }
 0x373   : > { %p3166_p12 = por %p3165_p2, %p3164_p0 }
 0x375   : > { %p3167_p7 = pnand %p3166_p12, %p3160_p13 }
 0x384   : > { %v1646_v50 = vpop.permute.xlu0 %1645 }
 0x385   : > { %v1652_v56 = vadd.f32 %v1646_v50, %v1375_v44 }
 0x388   : > { %v1648_v52 = vpop.permute.xlu0 %1647 }
 0x389   : > { %v1649_v53 = vsel %vm1031_vm1, %v1646_v50, %v1648_v52 }
 0x38a   : > { %v1653_v54 = vadd.f32 %v1649_v53, %v1377_v45 }
 0x38c   : > { %v1674_v57 = vadd.f32 %v1670_v55, %v1653_v54  ;;  %v1634_v58 = vpop.permute.xlu0 %1633 }
 0x38d   : > { %v1636_v59 = vadd.f32 %v1634_v58, %v1375_v44  ;;  %v1669_v60 = vsel %vm1668_vm2, %v1634_v58, %v1665_v49 }
 0x38e   : > { %v2372_v61 = vmul.f32 -1.442695, %v1674_v57  ;;  %v1673_v62 = vadd.f32 %v1669_v60, %v1652_v56 }
 0x38f   : > { %v2370_v63 = vmul.f32 -1.442695, %v1636_v59 }
 0x390   : > { %2653 = vpow2.f32 %v2372_v61  ;;  %v2371_v0 = vmul.f32 -1.442695, %v1673_v62 }
 0x391   : > { %2655 = vpow2.f32 %v2370_v63  ;;  %v1026_v63 = vld [vmem:[%s854_s21] sm:$0xff] }
 0x392   : > { %2657 = vpow2.f32 %v2371_v0 }
 0x393   : > { %2659 = vpow2.f32 %v2365_v2 }
 0x39a   : > { %v2654_v3 = vpop.eup %2653 }
 0x39b   : > { %v2656_v4 = vpop.eup %2655  ;;  %v1682_v5 = vadd.f32 1.0, %v2654_v3 }
 0x39c   : > { %v2658_v6 = vpop.eup %2657  ;;  %v1640_v7 = vadd.f32 1.0, %v2656_v4 }
 0x39d   : > { %2661 = vrcp.f32 %v1682_v5  ;;  %v1681_v8 = vadd.f32 1.0, %v2658_v6  ;;  %v2660_v9 = vpop.eup %2659 }
 0x39e   : > { %2663 = vrcp.f32 %v1640_v7  ;;  %v1295_v11 = vadd.f32 1.0, %v2660_v9 }
 0x39f   : > { %2665 = vrcp.f32 %v1681_v8 }
 0x3a0   : > { %2667 = vrcp.f32 %v1295_v11 }
 0x3a7   : > { %v4102_v10 = vpop.eup %2661 }
 0x3a8   : > { %v2664_v12 = vpop.eup %2663  ;;  %1754 = vrot.lane.b32.xlu1 %v4102_v10, %s3376_s3 }
 0x3a9   : > { %v4106_v13 = vpop.eup %2665  ;;  %v1687_v14 = vsel %vm1031_vm1, %v2664_v12, -inf }
 0x3aa   : > { %v1688_v15 = vrot.slane %v1687_v14, 4  ;;  %1749 = vrot.lane.b32.xlu0 %v4106_v13, %s3376_s3  ;;  %v4111_v21 = vpop.eup %2667 }
 0x3ac   : > { %v1689_v16 = vmax.f32 %v1687_v14, %v1688_v15 }
 0x3ae   : > { %v1690_v17 = vrot.slane %v1689_v16, 2 }
 0x3b0   : > { %v1691_v18 = vmax.f32 %v1689_v16, %v1690_v17 }
 0x3b2   : > { %v1692_v19 = vrot.slane %v1691_v18, 1 }
 0x3b4   : > { %v1693_v20 = vmax.f32 %v1691_v18, %v1692_v19  ;;  %v1834_v19 = vrot.slane %v1029_v51, %v4090_v29 }
 0x3b6   : > { %v1694_v22 = vmax.f32 %v1693_v20, %v4111_v21 }
 0x3b8   : > { %v1698_v24 = vrot.slane %v1694_v22, %v4090_v29  ;;  %v1702_v27 = vsub.f32 %v4111_v21, %v1694_v22 }
 0x3ba   : > { %v1699_v25 = vsub.f32 %v2664_v12, %v1698_v24  ;;  %v1703_v28 = vmul.f32 1.442695, %v1702_v27 }
 0x3bc   : > { %v1700_v26 = vmul.f32 1.442695, %v1699_v25 }
 0x3be   : > { %2669 = vpow2.f32 %v1700_v26 }
 0x3bf   : > { %2671 = vpow2.f32 %v1703_v28 }
 0x3c8   : > { %v2670_v30 = vpop.eup %2669 }
 0x3c9   : > { %v1705_v31 = vsel %vm1031_vm1, %v2670_v30, 0.0  ;;  %v2672_v37 = vpop.eup %2671 }
 0x3ca   : > { %v1706_v32 = vrot.slane %v1705_v31, 4 }
 0x3cc   : > { %v1707_v33 = vadd.f32 %v1706_v32, %v1705_v31 }
 0x3ce   : > { %v1708_v1 = vrot.slane %v1707_v33, 2 }
 0x3d0   : > { %v1709_v34 = vadd.f32 %v1708_v1, %v1707_v33 }
 0x3d2   : > { %v1710_v35 = vrot.slane %v1709_v34, 1 }
 0x3d4   : > { %v1711_v36 = vadd.f32 %v1710_v35, %v1709_v34 }
 0x3d6   : > { %v1712_v38 = vadd.f32 %v2672_v37, %v1711_v36 }
 0x3d8   : > { %2673 = vrcp.f32 %v1712_v38 }
 0x3e2   : > { %v2674_v39 = vpop.eup %2673 }
 0x3e3   : > { %v1717_v40 = vrot.slane %v2674_v39, %v4090_v29  ;;  %v1728_v49 = vmul.f32 %v2674_v39, %v2672_v37 }
 0x3e5   : > { %v1718_v42 = vmul.f32 %v2670_v30, %v1717_v40  ;;  %v1729_v53 = vmul.f32 %v1728_v49, %v1029_v51 }
 0x3e7   : > { %v1719_v43 = vmul.f32 %v1718_v42, %v1023_v41 }
 0x3e9   : > { %v1720_v44 = vsel %vm1031_vm1, %v1719_v43, 0.0 }
 0x3ea   : > { %v1721_v45 = vrot.slane %v1720_v44, 4 }
 0x3ec   : > { %v1722_v46 = vadd.f32 %v1721_v45, %v1720_v44 }
 0x3ee   : > { %v1723_v47 = vrot.slane %v1722_v46, 2 }
 0x3f0   : > { %v1724_v48 = vadd.f32 %v1723_v47, %v1722_v46 }
 0x3f2   : > { %v1725_v50 = vrot.slane %v1724_v48, 1 }
 0x3f4   : > { %v1726_v52 = vadd.f32 %v1725_v50, %v1724_v48 }
 0x3f6   : > { %v1727_v54 = vmul.f32 0.125, %v1726_v52 }
 0x3f8   : > { %v1730_v55 = vadd.f32 %v1729_v53, %v1727_v54 }
 0x3fa   : > { %1742 = vst.msk [vmem:[%s1015_s16] sm:$0x1] %vm1741_vm3, %v1730_v55 }
 0x41a   : > { %v1755_v56 = vpop.permute.xlu1 %1754 }
 0x41b   : > { %v1757_v57 = vmax.f32 %v4106_v13, %v1755_v56 }
 0x41c   : > { %v1750_v58 = vpop.permute.xlu0 %1749 }
 0x41d   : > { %1759 = vrot.lane.b32.xlu1 %v1757_v57, %s3374_s27  ;;  %v1752_v59 = vmax.f32 %v4106_v13, %v1750_v58 }
 0x48f   : > { %v1760_v60 = vpop.permute.xlu1 %1759 }
 0x490   : > { %v1762_v61 = vmax.f32 %v1752_v59, %v1760_v60 }
 0x492   : > { %v1763_v62 = vmax.f32 %v1762_v61, %v4102_v10 }
 0x494   : > { %1774 = vrot.lane.b32.xlu1 %v1763_v62, %s3374_s27  ;;  %1768 = vrot.lane.b32.xlu0 %v1763_v62, %s3375_s9  ;;  %v1764_v25 = vsub.f32 %v4106_v13, %v1763_v62  ;;  %v1786_v27 = vsub.f32 %v4102_v10, %v1763_v62 }
 0x496   : > { %v1765_v26 = vmul.f32 1.442695, %v1764_v25  ;;  %v1787_v28 = vmul.f32 1.442695, %v1786_v27 }
 0x498   : > { %1780 = vrot.lane.b32.xlu0 %v1763_v62, %s3376_s3  ;;  %1812 = vrot.lane.b32.xlu1 %v1026_v63, %s3374_s27 }
 0x49c   : > { %1821 = vrot.lane.b32.xlu0 %v4086_v23, %s3376_s3  ;;  %v1025_v23 = vld [vmem:[%s845_s23] sm:$0xff]  ;;  %s4462_s23 = sld [smem:[#allocation70_spill]] }
 0x4a2   : > { %s4168_s21 = scalar_lea.hbm %s4462_s23, %s4381_s29 }
 0x506   : > { %v1775_v0 = vpop.permute.xlu1 %1774  ;;  %v1769_v2 = vpop.permute.xlu0 %1768 }
 0x507   : > { %v1777_v3 = vsub.f32 %v4106_v13, %v1775_v0  ;;  %v1771_v4 = vsub.f32 %v4106_v13, %v1769_v2 }
 0x509   : > { %v1778_v5 = vmul.f32 1.442695, %v1777_v3  ;;  %v1772_v6 = vmul.f32 1.442695, %v1771_v4 }
 0x50a   : > { %v1781_v7 = vpop.permute.xlu0 %1780  ;;  %v1813_v16 = vpop.permute.xlu1 %1812 }
 0x50b   : > { %2675 = vpow2.f32 %v1778_v5  ;;  %v1783_v8 = vsub.f32 %v4102_v10, %v1781_v7 }
 0x50c   : > { %2677 = vpow2.f32 %v1772_v6 }
 0x50d   : > { %v1784_v9 = vmul.f32 1.442695, %v1783_v8 }
 0x50e   : > { %v1822_v15 = vpop.permute.xlu0 %1821 }
 0x50f   : > { %2679 = vpow2.f32 %v1784_v9 }
 0x510   : > { %2681 = vtanh.f32 %v1029_v51 }
 0x511   : > { %2683 = vpow2.f32 %v1765_v26 }
 0x512   : > { %2685 = vpow2.f32 %v1787_v28 }
 0x515   : > { %v2676_v11 = vpop.eup %2675 }
 0x516   : > { %v2678_v12 = vpop.eup %2677  ;;  %1795 = vrot.lane.b32.xlu0 %v2676_v11, %s3374_s27  ;;  %v1824_v17 = vmul.f32 %v2676_v11, %v1822_v15 }
 0x517   : > { %1790 = vrot.lane.b32.xlu1 %v2678_v12, %s3376_s3  ;;  %v1815_v18 = vmul.f32 %v2678_v12, %v1813_v16 }
 0x519   : > { %v2680_v14 = vpop.eup %2679 }
 0x51a   : > { %1807 = vrot.lane.b32.xlu0 %v1025_v23, %s3375_s9  ;;  %v2682_v20 = vpop.eup %2681  ;;  %v1836_v22 = vmul.f32 %v2680_v14, %v1834_v19 }
 0x51b   : > { %1800 = vrot.lane.b32.xlu1 %v2680_v14, %s3375_s9  ;;  %v1736_v24 = vrot.slane %v2682_v20, %v4090_v29  ;;  %v2684_v31 = vpop.eup %2683 }
 0x51c   : > { %v2686_v36 = vpop.eup %2685 }
 0x51e   : > { %1826 = vrot.lane.b32.xlu0 %v1824_v17, %s3374_s27 }
 0x51f   : > { %1817 = vrot.lane.b32.xlu1 %v1815_v18, %s3376_s3 }
 0x522   : > { %1843 = vrot.lane.b32.xlu0 %v1023_v41, %s3375_s9 }
 0x523   : > { %1838 = vrot.lane.b32.xlu1 %v1836_v22, %s3375_s9 }
 0x526   : > { %1737 = vrot.lane.b32.xlu0 %v1736_v24, %s3375_s9 }
 0x588   : > { %v1796_v30 = vpop.permute.xlu0 %1795 }
 0x589   : > { %v1791_v32 = vpop.permute.xlu1 %1790 }
 0x58a   : > { %v1793_v33 = vadd.f32 %v2684_v31, %v1791_v32 }
 0x58c   : > { %v1798_v1 = vadd.f32 %v1796_v30, %v1793_v33  ;;  %v1808_v34 = vpop.permute.xlu0 %1807 }
 0x58d   : > { %v1801_v35 = vpop.permute.xlu1 %1800  ;;  %v1810_v38 = vmul.f32 %v2684_v31, %v1808_v34 }
 0x58e   : > { %v1803_v29 = vadd.f32 %v1801_v35, %v1798_v1 }
 0x590   : > { %v1804_v37 = vadd.f32 %v2686_v36, %v1803_v29  ;;  %v1827_v39 = vpop.permute.xlu0 %1826 }
 0x591   : > { %v1818_v40 = vpop.permute.xlu1 %1817 }
 0x592   : > { %2687 = vrcp.f32 %v1804_v37  ;;  %v1820_v13 = vadd.f32 %v1818_v40, %v1810_v38 }
 0x594   : > { %v1829_v41 = vadd.f32 %v1827_v39, %v1820_v13  ;;  %v1844_v42 = vpop.permute.xlu0 %1843 }
 0x595   : > { %v1839_v43 = vpop.permute.xlu1 %1838  ;;  %v1846_v45 = vmul.f32 %v2686_v36, %v1844_v42 }
 0x596   : > { %v1841_v44 = vadd.f32 %v1839_v43, %v1829_v41 }
 0x598   : > { %v1738_v46 = vpop.permute.xlu0 %1737  ;;  %v1847_v48 = vadd.f32 %v1846_v45, %v1841_v44 }
 0x599   : > { %v1740_v47 = vmul.f32 %v4111_v21, %v1738_v46 }
 0x59b   : > { %1744 = vrot.lane.b32.xlu0 %v1740_v47, %s3376_s3 }
 0x59c   : > { %v2688_v49 = vpop.eup %2687 }
 0x59d   : > { %v1848_v50 = vmul.f32 %v2688_v49, %v1847_v48 }
 0x59f   : > { %2689 = vtanh.f32 %v1848_v50 }
 0x5a9   : > { %v2690_v51 = vpop.eup %2689 }
 0x5aa   : > { %1851 = vrot.lane.b32.xlu1 %v2690_v51, %s3375_s9 }
 0x60d   : > { %v1745_v52 = vpop.permute.xlu0 %1744 }
 0x60e   : > { %1747 = vst.msk [vmem:[%s1021_s19] sm:$0x1] %vm1741_vm3, %v1745_v52 }
 0x61c   : > { %v1852_v21 = vpop.permute.xlu1 %1851 }
 0x61d   : > { %v1854_v53 = vmul.f32 %v4102_v10, %v1852_v21 }
 0x61e   : > { %3170 = shalt.err (!%p3167_p7)
}
 0x61f   : > { %s3171_s9 = scalar_lea.hbm %s4168_s21, 16  ;;  %s3175_s0 = scalar_lea.hbm %s4462_s23, 32 }
 0x620   : > { %p3172_p4 = scmp.ne.s32.totalorder %s4168_s21, %s3171_s9  ;;  %p3176_p8 = scmp.lt.u32.totalorder %s4168_s21, %s4462_s23 }
 0x621   : > { %p3177_p10 = scmp.lt.u32.totalorder %s3175_s0, %s3171_s9  ;;  %p3179_p1 = scmp.lt.u32.totalorder %s3171_s9, %s4168_s21 }
 0x622   : > { %p3173_p6 = pnand %p3172_p4, %p4463_p9 }
 0x623   : > { %p3178_p11 = por %p3177_p10, %p3176_p8 }
 0x624   : > { %p3174_p5 = pneg %p3173_p6 }
 0x625   : > { %p3180_p3 = por %p3179_p1, %p3178_p11 }
 0x627   : > { %p3181_p13 = pnand %p3180_p3, %p3174_p5 }
 0x629   : > { %3184 = shalt.err (!%p3181_p13)
}
 0x62a   : > { %2518 = dma.vmem_to_hbm [thread:$0]  (%p4463_p9), %s4170_s13, 16, %s4168_s21, %s1880_s4   ;;  %1861 = vrot.lane.b32.xlu1 %v1854_v53, %s3374_s27 }
 0x62b   : > { %s2375_s25 = sshll.u32 %s3502_s2, 7  ;;  %s1009_s6 = scalar_lea.vmem [#allocation29], %s4001_s26 }
 0x62c   : > { %s1905_s9 = sshll.u32 %s1009_s6, 4  ;;  %s1918_s19 = sshll.u32 %s1015_s16, 4  ;;  %s4209_s9 = int_to_ptr.vmem [resolvable:$true] %s1905_s9  ;;  %s4218_s19 = int_to_ptr.vmem [resolvable:$true] %s1918_s19 }
 0x62d   : > { %s4464_s17 = sld [smem:[#allocation68_spill]]  ;;  %s4384_s29 = scalar_lea.vmem [#allocation28], %s4001_s26 }
 0x62e   : > { %1856 = vrot.lane.b32.xlu1 %v1848_v50, %s3376_s3  ;;  %s1892_s1 = sshll.u32 %s4384_s29, 4  ;;  %s4465_s27 = sshll.u32 %s3502_s2, 4  ;;  %s4226_s1 = int_to_ptr.vmem [resolvable:$true] %s1892_s1 }
 0x62f   : > { %s4466_s13 = sld [smem:[#allocation69_spill]]  ;;  %s4467_s0 = sld [smem:[#allocation67_spill]] }
 0x630   : > { %s1871_s8 = scalar_lea.sflag [#allocation30], %s4010_s5  ;;  %s3185_s10 = scalar_lea.vmem %s4209_s9, 128 }
 0x631   : > { %p3186_p0 = scmp.ne.s32.totalorder %s4209_s9, %s3185_s10  ;;  %s3378_s2 = smov [#allocation29]  }
 0x633   : > { %s4204_s28 = scalar_lea.hbm %s4464_s17, %s2375_s25  ;;  %p3187_p2 = pnand %p3186_p0, %p4463_p9 }
 0x635   : > { %s4216_s4 = scalar_lea.hbm %s4466_s13, %s4465_s27  ;;  %s4468_s7 = smov %s4467_s0 }
 0x636   : > { %s4224_s29 = scalar_lea.hbm %s4467_s0, %s2375_s25  ;;  %p3188_p12 = pneg %p3187_p2 }
 0x637   : > { %s3189_s27 = sshll.u32 %s3378_s2, 4  ;;  %s3190_s27 = int_to_ptr.vmem [resolvable:$false] %s3189_s27 }
 0x638   : > { %s3191_s3 = scalar_lea.vmem %s3190_s27, 256  ;;  %p3192_p7 = scmp.lt.s32.totalorder %s4209_s9, %s3190_s27 }
 0x639   : > { %p3193_p4 = scmp.lt.s32.totalorder %s3191_s3, %s3185_s10 }
 0x63b   : > { %p3194_p6 = por %p3193_p4, %p3192_p7 }
 0x63d   : > { %p3195_p5 = pnand %p3194_p6, %p3188_p12 }
 0x69c   : > { %v1862_v10 = vpop.permute.xlu1 %1861 }
 0x69d   : > { %1864 = vst.msk [vmem:[%s1009_s6] sm:$0xff] %vm1031_vm1, %v1862_v10 }
 0x69e   : > { %3198 = shalt.err (!%p3195_p5)
}
 0x69f   : > { %s3199_s25 = scalar_lea.hbm %s4204_s28, 128  ;;  %s3203_s16 = scalar_lea.hbm %s4464_s17, 256 }
 0x6a0   : > { %p3200_p8 = scmp.ne.s32.totalorder %s4204_s28, %s3199_s25  ;;  %p3204_p1 = scmp.lt.u32.totalorder %s4204_s28, %s4464_s17 }
 0x6a1   : > { %p3205_p3 = scmp.lt.u32.totalorder %s3203_s16, %s3199_s25  ;;  %p3207_p0 = scmp.lt.u32.totalorder %s3199_s25, %s4204_s28 }
 0x6a2   : > { %p3201_p10 = pnand %p3200_p8, %p4463_p9 }
 0x6a3   : > { %p3206_p13 = por %p3205_p3, %p3204_p1 }
 0x6a4   : > { %p3202_p11 = pneg %p3201_p10 }
 0x6a5   : > { %p3208_p2 = por %p3207_p0, %p3206_p13 }
 0x6a7   : > { %p3209_p12 = pnand %p3208_p2, %p3202_p11 }
 0x6a9   : > { %3212 = shalt.err (!%p3209_p12)
}
 0x6aa   : > { %2516 = dma.vmem_to_hbm [thread:$0]  (%p4463_p9), %s4209_s9, 128, %s4204_s28, %s1871_s8  }
 0x6ab   : > { %s3213_s10 = scalar_lea.vmem %s4218_s19, 16  ;;  %s3379_s2 = smov [#allocation31]  }
 0x6ac   : > { %p3214_p7 = scmp.ne.s32.totalorder %s4218_s19, %s3213_s10  ;;  %s3217_s27 = sshll.u32 %s3379_s2, 4  ;;  %s3218_s27 = int_to_ptr.vmem [resolvable:$false] %s3217_s27 }
 0x6ad   : > { %s3219_s3 = scalar_lea.vmem %s3218_s27, 32  ;;  %p3220_p5 = scmp.lt.s32.totalorder %s4218_s19, %s3218_s27 }
 0x6ae   : > { %p3215_p4 = pnand %p3214_p7, %p4463_p9  ;;  %p3221_p8 = scmp.lt.s32.totalorder %s3219_s3, %s3213_s10 }
 0x6b0   : > { %p3216_p6 = pneg %p3215_p4  ;;  %p3222_p10 = por %p3221_p8, %p3220_p5 }
 0x6b2   : > { %p3223_p11 = pnand %p3222_p10, %p3216_p6 }
 0x6b4   : > { %3226 = shalt.err (!%p3223_p11)
}
 0x6b5   : > { %s3227_s9 = scalar_lea.hbm %s4216_s4, 16  ;;  %s3231_s6 = scalar_lea.hbm %s4466_s13, 32 }
 0x6b6   : > { %p3228_p1 = scmp.ne.s32.totalorder %s4216_s4, %s3227_s9  ;;  %p3232_p0 = scmp.lt.u32.totalorder %s4216_s4, %s4466_s13 }
 0x6b7   : > { %p3233_p2 = scmp.lt.u32.totalorder %s3231_s6, %s3227_s9  ;;  %p3235_p7 = scmp.lt.u32.totalorder %s3227_s9, %s4216_s4 }
 0x6b8   : > { %p3229_p3 = pnand %p3228_p1, %p4463_p9 }
 0x6b9   : > { %p3234_p12 = por %p3233_p2, %p3232_p0 }
 0x6ba   : > { %p3230_p13 = pneg %p3229_p3 }
 0x6bb   : > { %p3236_p4 = por %p3235_p7, %p3234_p12 }
 0x6bd   : > { %p3237_p6 = pnand %p3236_p4, %p3230_p13 }
 0x6bf   : > { %3240 = shalt.err (!%p3237_p6)
}
 0x6c0   : > { %2517 = dma.vmem_to_hbm [thread:$0]  (%p4463_p9), %s4218_s19, 16, %s4216_s4, %s1871_s8   ;;  %v1857_v54 = vpop.permute.xlu1 %1856 }
 0x6c1   : > { %s4469_s24 = scalar_lea.vmem [#allocation28], %s4001_s26  ;;  %s1866_s0 = scalar_lea.sflag [#allocation4], %s3998_s20 }
 0x6c2   : > { %1859 = vst.msk [vmem:[%s4469_s24] sm:$0xff] %vm1031_vm1, %v1857_v54  ;;  %s3241_s10 = scalar_lea.vmem %s4226_s1, 128  ;;  %s3380_s5 = smov [#allocation28]  }
 0x6c3   : > { %p3242_p5 = scmp.ne.s32.totalorder %s4226_s1, %s3241_s10  ;;  %s3245_s2 = sshll.u32 %s3380_s5, 4  ;;  %s3246_s2 = int_to_ptr.vmem [resolvable:$false] %s3245_s2 }
 0x6c4   : > { %s3247_s27 = scalar_lea.vmem %s3246_s2, 256  ;;  %p3248_p11 = scmp.lt.s32.totalorder %s4226_s1, %s3246_s2 }
 0x6c5   : > { %p3243_p8 = pnand %p3242_p5, %p4463_p9  ;;  %p3249_p1 = scmp.lt.s32.totalorder %s3247_s27, %s3241_s10 }
 0x6c7   : > { %p3244_p10 = pneg %p3243_p8  ;;  %p3250_p3 = por %p3249_p1, %p3248_p11 }
 0x6c9   : > { %p3251_p13 = pnand %p3250_p3, %p3244_p10 }
 0x6cb   : > { %3254 = shalt.err (!%p3251_p13)
}
 0x6cc   : > { %s3255_s8 = scalar_lea.hbm %s4224_s29, 128  ;;  %s3259_s19 = scalar_lea.hbm %s4468_s7, 256 }
 0x6cd   : > { %p3256_p0 = scmp.ne.s32.totalorder %s4224_s29, %s3255_s8  ;;  %p3260_p7 = scmp.lt.u32.totalorder %s4224_s29, %s4468_s7 }
 0x6ce   : > { %p3261_p4 = scmp.lt.u32.totalorder %s3259_s19, %s3255_s8  ;;  %p3263_p5 = scmp.lt.u32.totalorder %s3255_s8, %s4224_s29 }
 0x6cf   : > { %p3257_p2 = pnand %p3256_p0, %p4463_p9 }
 0x6d0   : > { %p3262_p6 = por %p3261_p4, %p3260_p7 }
 0x6d1   : > { %p3258_p12 = pneg %p3257_p2 }
 0x6d2   : > { %p3264_p8 = por %p3263_p5, %p3262_p6 }
 0x6d4   : > { %p3265_p10 = pnand %p3264_p8, %p3258_p12 }
 0x6d6   : > { %3268 = shalt.err (!%p3265_p10)
}
 0x6d7   : > { %2515 = dma.vmem_to_hbm [thread:$0]  (%p4463_p9), %s4226_s1, 128, %s4224_s29, %s1866_s0  }
 0x6d8 PF: > { %s4470_s9 = sld [smem:[#allocation46_spill]]  ;;  %s4471_s28 = sld [smem:[#allocation53_spill]] }
 0x6d9   : > { %s4472_s25 = sld [smem:[#allocation48_spill]] }
 0x6de   : > { %s1943_s6 = sand.u32 1, %s4470_s9   ;;  %p4473_p11 = scmp.ne.s32.totalorder %s4471_s28, 0 }
 0x6df   : > { %p4474_p1 = scmp.ge.s32.totalorder %s4472_s25, 2  ;;  %s1944_s21 = scalar_lea.sflag [#allocation4], %s1943_s6 }
 0x6e1   : > { %p2574_p3 = pnand %p4474_p1, %p4473_p11 }
 0x6e3   : > { %3322 = dma.done.wait (!%p2574_p3), %s1944_s21, 128  }
 0x6e4   : > { %3324 = vsyncadd (!%p2574_p3), %s1944_s21, 4294967168  ;;  %s4475_s16 = sadd.s32 4294967294, %s4472_s25  }
 0x6e5   : > { %s1952_s24 = sand.u32 1, %s4475_s16  }
 0x6e6   : > { %s1953_s10 = scalar_lea.sflag [#allocation30], %s1952_s24 }
 0x6e7   : > { %3326 = dma.done.wait (!%p2574_p3), %s1953_s10, 144  }
 0x6e8   : > { %3328 = vsyncadd (!%p2574_p3), %s1953_s10, 4294967152  ;;  %s1970_s22 = scalar_lea.sflag [#allocation33], %s1943_s6 }
 0x6e9   : > { %3330 = dma.done.wait (!%p2574_p3), %s1970_s22, 16  }
 0x6ea   : > { %3332 = vsyncadd (!%p2574_p3), %s1970_s22, 4294967280  ;;  %s4476_s21 = sld [smem:[#allocation50_spill]]  ;;  %s4477_s1 = sld [smem:[#allocation47_spill]] }
 0x6eb   : > { %s4478_s20 = sld [smem:[#allocation51_spill]]  ;;  %s4479_s0 = smov %s3339_s30 }
 0x6f0   : > { %p55_p9 = scmp.ge.s32.totalorder %s4476_s21, 4   ;;  %s4480_s30 = smov %s4477_s1 }
 0x6f2   :  { %57 = sbr.rel (!%p55_p9) target bundleno = 39 (0x27), region = 302 }
 0x6f9   :  { %1974 = vsyncpa [#allocation3], 1 }
 0x6fa   :  { %1976 = vsyncpa [#allocation3 + $0x1], 1 }
 0x6fb   :  { %1977 = vsyncpa [#allocation6], 1 }
 0x6fc   :  { %1979 = vsyncpa [#allocation6 + $0x1], 1 }
 0x6fd   :  { %1980 = vsyncpa [#allocation9], 1 }
 0x6fe   :  { %1982 = vsyncpa [#allocation9 + $0x1], 1 }
 0x6ff   :  { %1983 = vsyncpa [#allocation12], 1 }
 0x700   :  { %1985 = vsyncpa [#allocation12 + $0x1], 1 }
 0x701   :  { %1986 = vsyncpa [#allocation15], 1 }
 0x702   :  { %1988 = vsyncpa [#allocation15 + $0x1], 1 }
 0x703   :  { %1989 = vsyncpa [#allocation18], 1 }
 0x704   :  { %1990 = vsyncpa [#allocation21], 1 }
 0x705   :  { %1991 = vsyncpa [#allocation24], 1 }
 0x706   :  { %1992 = vsyncpa [#allocation27], 1 }
 0x707   :  { %1993 = vsyncpa [#allocation4], 1 }
 0x708   :  { %1995 = vsyncpa [#allocation4 + $0x1], 1 }
 0x709   :  { %1996 = vsyncpa [#allocation30], 1 }
 0x70a   :  { %1998 = vsyncpa [#allocation30 + $0x1], 1 }
 0x70b   :  { %1999 = vsyncpa [#allocation33], 1 }
 0x70c   :  { %2001 = vsyncpa [#allocation33 + $0x1], 1 }

</bundles_post_ra>
